<compile_context>
chip_gen: v7x
topology: tpu7x:2x2x1
jax: 0.10.0
libtpu: 0.0.40
codegen_flags: <defaults>
</compile_context>

<pallas_src>
import functools
import math

import jax
import jax.numpy as jnp
from jax.experimental import pallas as pl
from jax.experimental.pallas import tpu as pltpu


# ------------------------------ model config ------------------------------- #

VOCAB = 100
MAX_POS = 16
HIDDEN = 32
HEADS = 4
HEAD_DIM = HIDDEN // HEADS
INTERMEDIATE = 64
NUM_LAYERS = 2
PROJ_DIM = 16
PAD_ID = 1            # RoBERTa padding_idx
LN_EPS = 1e-5
MASK_NEG = -1e30      # large-negative additive mask (finite -> no inf/nan paths)


# --------------------------- in-kernel helpers ----------------------------- #

def _layer_norm(h, gamma, beta):
    """LayerNorm over the last axis (f32 statistics). gamma/beta: [1, N]."""
    mu = jnp.mean(h, axis=-1, keepdims=True)
    var = jnp.mean(jnp.square(h - mu), axis=-1, keepdims=True)
    return (h - mu) * jax.lax.rsqrt(var + LN_EPS) * gamma + beta


def _gelu(y):
    # exact (erf) GELU, matching torch.nn.GELU default / RoBERTa "gelu"
    return 0.5 * y * (1.0 + jax.lax.erf(y * 0.7071067811865476))


# ----------------------------- fused Pallas kernel ------------------------- #

def _fused_encoder_kernel(
    x_ref,                      # (R, H)     summed embeddings, R = B*S rows
    bias_ref,                   # (R, R)     block-diag batch mask + key-pad mask
    emb_g_ref, emb_b_ref,       # (1, H)
    wqkv_ref, bqkv_ref,         # (L, H, 3H), (L, 1, 3H)
    wo_ref, bo_ref,             # (L, H, H),  (L, 1, H)
    ln1_g_ref, ln1_b_ref,       # (L, 1, H)
    wi_ref, bi_ref,             # (L, H, I),  (L, 1, I)
    wf_ref, bf_ref,             # (L, I, H),  (L, 1, H)
    ln2_g_ref, ln2_b_ref,       # (L, 1, H)
    pw1_ref, pb1_ref,           # (H, P), (1, P)
    pw2_ref, pb2_ref,           # (P, P), (1, P)
    pg_ref, pbeta_ref,          # (1, P)
    o_ref,                      # (R, P)
    *, scale,
):
    R = x_ref.shape[0]
    x = x_ref[...]                                  # (R, H) f32
    bias = bias_ref[...]                            # (R, R) f32

    # --- embedding LayerNorm (no residual, no zero tensor) ---
    x = _layer_norm(x, emb_g_ref[...], emb_b_ref[...])

    # --- encoder layers (static unroll; all intermediates stay in VMEM/vregs) ---
    for l in range(NUM_LAYERS):
        # fused QKV projection: one MXU pass, lane width 3*H, all batches at once
        qkv = (jnp.dot(x, wqkv_ref[l], preferred_element_type=jnp.float32)
               + bqkv_ref[l])                       # (R, 3H)

        wo_l = wo_ref[l]                            # (H, H), loaded once per layer
        attn_out = jnp.zeros((R, HIDDEN), jnp.float32)
        for h in range(HEADS):
            lo = h * HEAD_DIM
            qh = qkv[:, lo:lo + HEAD_DIM]                              # (R, Dh)
            kh = qkv[:, HIDDEN + lo:HIDDEN + lo + HEAD_DIM]            # (R, Dh)
            vh = qkv[:, 2 * HIDDEN + lo:2 * HIDDEN + lo + HEAD_DIM]    # (R, Dh)

            # scores (q @ k^T), scale, block-diag+pad bias, stable softmax
            s = jax.lax.dot_general(
                qh, kh, (((1,), (1,)), ((), ())),
                preferred_element_type=jnp.float32) * scale            # (R, R)
            s = s + bias
            m = jnp.max(s, axis=-1, keepdims=True)
            p = jnp.exp(s - m)
            denom = jnp.sum(p, axis=-1, keepdims=True)
            p = p * pl.reciprocal(denom, approx=True)                  # EUP divide

            ctx_h = jnp.dot(p, vh, preferred_element_type=jnp.float32)  # (R, Dh)
            # head "merge" folded into the output projection:
            #   ctx @ W_O == sum_h ctx_h @ W_O[h*Dh:(h+1)*Dh, :]
            attn_out = attn_out + jnp.dot(
                ctx_h, wo_l[lo:lo + HEAD_DIM, :],
                preferred_element_type=jnp.float32)
        attn_out = attn_out + bo_ref[l]

        # residual + LN1
        x = _layer_norm(attn_out + x, ln1_g_ref[l], ln1_b_ref[l])

        # FFN (GELU) + residual + LN2
        ffn = _gelu(jnp.dot(x, wi_ref[l], preferred_element_type=jnp.float32)
                    + bi_ref[l])
        ffn = (jnp.dot(ffn, wf_ref[l], preferred_element_type=jnp.float32)
               + bf_ref[l])
        x = _layer_norm(ffn + x, ln2_g_ref[l], ln2_b_ref[l])

    # --- ProjectionHead: linear -> GELU -> linear -> (dropout=id) -> LayerNorm ---
    h1 = _gelu(jnp.dot(x, pw1_ref[...], preferred_element_type=jnp.float32)
               + pb1_ref[...])
    h2 = (jnp.dot(h1, pw2_ref[...], preferred_element_type=jnp.float32)
          + pb2_ref[...])
    o_ref[...] = _layer_norm(h2, pg_ref[...], pbeta_ref[...]).astype(o_ref.dtype)


# ------------------------------ parameters --------------------------------- #

def init_params(key):
    keys = iter(jax.random.split(key, 16))

    def nrm(shape, s=0.02):
        return jax.random.normal(next(keys), shape, dtype=jnp.float32) * s

    ones = lambda *shape: jnp.ones(shape, jnp.float32)
    zeros = lambda *shape: jnp.zeros(shape, jnp.float32)
    L = NUM_LAYERS

    return dict(
        word_emb=nrm((VOCAB, HIDDEN)),
        pos_emb=nrm((MAX_POS, HIDDEN)),
        type_emb=nrm((1, HIDDEN)),
        emb_ln_g=ones(1, HIDDEN), emb_ln_b=zeros(1, HIDDEN),
        # layer-stacked encoder weights (fused QKV)
        wqkv=nrm((L, HIDDEN, 3 * HIDDEN)), bqkv=zeros(L, 1, 3 * HIDDEN),
        wo=nrm((L, HIDDEN, HIDDEN)), bo=zeros(L, 1, HIDDEN),
        ln1_g=ones(L, 1, HIDDEN), ln1_b=zeros(L, 1, HIDDEN),
        wi=nrm((L, HIDDEN, INTERMEDIATE)), bi=zeros(L, 1, INTERMEDIATE),
        wf=nrm((L, INTERMEDIATE, HIDDEN)), bf=zeros(L, 1, HIDDEN),
        ln2_g=ones(L, 1, HIDDEN), ln2_b=zeros(L, 1, HIDDEN),
        # projection head
        proj_w1=nrm((HIDDEN, PROJ_DIM)), proj_b1=zeros(1, PROJ_DIM),
        proj_w2=nrm((PROJ_DIM, PROJ_DIM)), proj_b2=zeros(1, PROJ_DIM),
        proj_ln_g=ones(1, PROJ_DIM), proj_ln_b=zeros(1, PROJ_DIM),
    )


# ------------------------------ forward pass ------------------------------- #

def roberta_encoder_forward(params, input_ids, attention_mask):
    B, S = input_ids.shape
    R = B * S
    scale = 1.0 / math.sqrt(HEAD_DIM)

    # --- RoBERTa embeddings (glue: gathers only; LN happens in the kernel) ---
    tok_mask = (input_ids != PAD_ID).astype(jnp.int32)
    position_ids = jnp.cumsum(tok_mask, axis=1) * tok_mask + PAD_ID
    emb = (params["word_emb"][input_ids]
           + params["pos_emb"][position_ids]
           + params["type_emb"][0][None, None, :]).astype(jnp.float32)   # (B, S, H)
    emb2d = emb.reshape(R, HIDDEN)

    # Block-diagonal batch mask AND key-padding mask, additive form.
    # (HF masks keys only; padded query rows are still computed -> identical.)
    batch_ids = jnp.repeat(jnp.arange(B, dtype=jnp.int32), S)            # (R,)
    key_valid = attention_mask.astype(jnp.int32).reshape(R)              # (R,)
    allowed = (batch_ids[:, None] == batch_ids[None, :]) & (key_valid[None, :] > 0)
    mask_bias = jnp.where(allowed, 0.0, MASK_NEG).astype(jnp.float32)    # (R, R)

    weight_args = (
        params["emb_ln_g"], params["emb_ln_b"],
        params["wqkv"], params["bqkv"], params["wo"], params["bo"],
        params["ln1_g"], params["ln1_b"],
        params["wi"], params["bi"], params["wf"], params["bf"],
        params["ln2_g"], params["ln2_b"],
        params["proj_w1"], params["proj_b1"],
        params["proj_w2"], params["proj_b2"],
        params["proj_ln_g"], params["proj_ln_b"],
    )

    # Grid-less single invocation: every array lives whole in VMEM (tiny model),
    # no per-step pipeline overhead, batch folded into the row axis.
    out2d = pl.pallas_call(
        functools.partial(_fused_encoder_kernel, scale=scale),
        out_shape=jax.ShapeDtypeStruct((R, PROJ_DIM), jnp.float32),
    )(emb2d, mask_bias, *weight_args)

    return out2d.reshape(B, S, PROJ_DIM)


# ---------------------------------- main ----------------------------------- #

if __name__ == "__main__":
    key = jax.random.PRNGKey(0)
    pkey, ikey = jax.random.split(key)
    params = init_params(pkey)

    B, S = 2, 8
    input_ids = jax.random.randint(ikey, (B, S), 2, VOCAB, dtype=jnp.int32)
    attention_mask = jnp.ones((B, S), dtype=jnp.int32)
    # make the last two tokens of the second sequence padding (RoBERTa pad id = 1)
    input_ids = input_ids.at[1, -2:].set(PAD_ID)
    attention_mask = attention_mask.at[1, -2:].set(0)

    fwd = jax.jit(roberta_encoder_forward)
    out = fwd(params, input_ids, attention_mask)
    out = jax.block_until_ready(out)

    assert out.shape == (B, S, PROJ_DIM), out.shape
    assert bool(jnp.all(jnp.isfinite(out)))
    print("KERNEL_OK")
</pallas_src>

<mosaic_0001>
module attributes {stable_mosaic.version = 11 : i64} {
  func.func @_fused_encoder_kernel(%arg0: memref<16x32xf32, #tpu.memory_space<vmem>>, %arg1: memref<16x16xf32, #tpu.memory_space<vmem>>, %arg2: memref<1x32xf32, #tpu.memory_space<vmem>>, %arg3: memref<1x32xf32, #tpu.memory_space<vmem>>, %arg4: memref<2x32x96xf32, #tpu.memory_space<vmem>>, %arg5: memref<2x1x96xf32, #tpu.memory_space<vmem>>, %arg6: memref<2x32x32xf32, #tpu.memory_space<vmem>>, %arg7: memref<2x1x32xf32, #tpu.memory_space<vmem>>, %arg8: memref<2x1x32xf32, #tpu.memory_space<vmem>>, %arg9: memref<2x1x32xf32, #tpu.memory_space<vmem>>, %arg10: memref<2x32x64xf32, #tpu.memory_space<vmem>>, %arg11: memref<2x1x64xf32, #tpu.memory_space<vmem>>, %arg12: memref<2x64x32xf32, #tpu.memory_space<vmem>>, %arg13: memref<2x1x32xf32, #tpu.memory_space<vmem>>, %arg14: memref<2x1x32xf32, #tpu.memory_space<vmem>>, %arg15: memref<2x1x32xf32, #tpu.memory_space<vmem>>, %arg16: memref<32x16xf32, #tpu.memory_space<vmem>>, %arg17: memref<1x16xf32, #tpu.memory_space<vmem>>, %arg18: memref<16x16xf32, #tpu.memory_space<vmem>>, %arg19: memref<1x16xf32, #tpu.memory_space<vmem>>, %arg20: memref<1x16xf32, #tpu.memory_space<vmem>>, %arg21: memref<1x16xf32, #tpu.memory_space<vmem>>, %arg22: memref<16x16xf32, #tpu.memory_space<vmem>>) attributes {dimension_semantics = [], scalar_prefetch = 0 : i64, scratch_operands = 0 : i64, tpu.core_type = #tpu.core_type<tc>} {
    %c0 = arith.constant 0 : index
    %c0_0 = arith.constant 0 : index
    %0 = vector.load %arg0[%c0, %c0_0] : memref<16x32xf32, #tpu.memory_space<vmem>>, vector<16x32xf32>
    %c0_1 = arith.constant 0 : index
    %c0_2 = arith.constant 0 : index
    %1 = vector.load %arg1[%c0_1, %c0_2] : memref<16x16xf32, #tpu.memory_space<vmem>>, vector<16x16xf32>
    %c0_3 = arith.constant 0 : index
    %c0_4 = arith.constant 0 : index
    %2 = vector.load %arg2[%c0_3, %c0_4] : memref<1x32xf32, #tpu.memory_space<vmem>>, vector<1x32xf32>
    %c0_5 = arith.constant 0 : index
    %c0_6 = arith.constant 0 : index
    %3 = vector.load %arg3[%c0_5, %c0_6] : memref<1x32xf32, #tpu.memory_space<vmem>>, vector<1x32xf32>
    %cst = arith.constant dense<0.000000e+00> : vector<16xf32>
    %4 = vector.multi_reduction <add>, %0, %cst [1] : vector<16x32xf32> to vector<16xf32>
    %5 = vector.shape_cast %4 : vector<16xf32> to vector<16x1xf32>
    %cst_7 = arith.constant 3.200000e+01 : f32
    %6 = vector.broadcast %cst_7 : f32 to vector<16x1xf32>
    %7 = arith.divf %5, %6 : vector<16x1xf32>
    %8 = vector.broadcast %7 : vector<16x1xf32> to vector<16x32xf32>
    %9 = arith.subf %0, %8 : vector<16x32xf32>
    %10 = arith.mulf %9, %9 : vector<16x32xf32>
    %cst_8 = arith.constant dense<0.000000e+00> : vector<16xf32>
    %11 = vector.multi_reduction <add>, %10, %cst_8 [1] : vector<16x32xf32> to vector<16xf32>
    %12 = vector.shape_cast %11 : vector<16xf32> to vector<16x1xf32>
    %cst_9 = arith.constant 3.200000e+01 : f32
    %13 = vector.broadcast %cst_9 : f32 to vector<16x1xf32>
    %14 = arith.divf %12, %13 : vector<16x1xf32>
    %15 = vector.broadcast %7 : vector<16x1xf32> to vector<16x32xf32>
    %16 = arith.subf %0, %15 : vector<16x32xf32>
    %cst_10 = arith.constant 9.99999974E-6 : f32
    %17 = vector.broadcast %cst_10 : f32 to vector<16x1xf32>
    %18 = arith.addf %14, %17 : vector<16x1xf32>
    %19 = math.rsqrt %18 : vector<16x1xf32>
    %20 = vector.broadcast %19 : vector<16x1xf32> to vector<16x32xf32>
    %21 = arith.mulf %16, %20 : vector<16x32xf32>
    %22 = vector.broadcast %2 : vector<1x32xf32> to vector<16x32xf32>
    %23 = arith.mulf %21, %22 : vector<16x32xf32>
    %24 = vector.broadcast %3 : vector<1x32xf32> to vector<16x32xf32>
    %25 = arith.addf %23, %24 : vector<16x32xf32>
    %c0_11 = arith.constant 0 : index
    %c0_12 = arith.constant 0 : index
    %c0_13 = arith.constant 0 : index
    %26 = vector.load %arg4[%c0_11, %c0_12, %c0_13] : memref<2x32x96xf32, #tpu.memory_space<vmem>>, vector<1x32x96xf32>
    %27 = vector.shape_cast %26 : vector<1x32x96xf32> to vector<32x96xf32>
    %cst_14 = arith.constant dense<0.000000e+00> : vector<16x96xf32>
    %28 = tpu.matmul %25, %27, %cst_14 {dimension_numbers = #tpu.dot_dimension_numbers<[1], [0], [0], [1], [0, 0, 1, 1], [], []>} : vector<16x32xf32>, vector<32x96xf32>, vector<16x96xf32> -> vector<16x96xf32>
    %c0_15 = arith.constant 0 : index
    %c0_16 = arith.constant 0 : index
    %c0_17 = arith.constant 0 : index
    %29 = vector.load %arg5[%c0_15, %c0_16, %c0_17] : memref<2x1x96xf32, #tpu.memory_space<vmem>>, vector<1x1x96xf32>
    %30 = vector.shape_cast %29 : vector<1x1x96xf32> to vector<1x96xf32>
    %31 = vector.broadcast %30 : vector<1x96xf32> to vector<16x96xf32>
    %32 = arith.addf %28, %31 : vector<16x96xf32>
    %c0_18 = arith.constant 0 : index
    %c0_19 = arith.constant 0 : index
    %c0_20 = arith.constant 0 : index
    %33 = vector.load %arg6[%c0_18, %c0_19, %c0_20] : memref<2x32x32xf32, #tpu.memory_space<vmem>>, vector<1x32x32xf32>
    %34 = vector.shape_cast %33 : vector<1x32x32xf32> to vector<32x32xf32>
    %cst_21 = arith.constant 0.000000e+00 : f32
    %35 = vector.broadcast %cst_21 : f32 to vector<16x32xf32>
    %36 = vector.extract_strided_slice %32 {offsets = [0, 0], sizes = [16, 8], strides = [1, 1]} : vector<16x96xf32> to vector<16x8xf32>
    %37 = vector.extract_strided_slice %32 {offsets = [0, 32], sizes = [16, 8], strides = [1, 1]} : vector<16x96xf32> to vector<16x8xf32>
    %38 = vector.extract_strided_slice %32 {offsets = [0, 64], sizes = [16, 8], strides = [1, 1]} : vector<16x96xf32> to vector<16x8xf32>
    %cst_22 = arith.constant dense<0.000000e+00> : vector<16x16xf32>
    %39 = tpu.matmul %36, %37, %cst_22 {dimension_numbers = #tpu.dot_dimension_numbers<[1], [1], [0], [0], [0, 0, 1, 0], [], []>} : vector<16x8xf32>, vector<16x8xf32>, vector<16x16xf32> -> vector<16x16xf32>
    %cst_23 = arith.constant 0.353553385 : f32
    %40 = vector.broadcast %cst_23 : f32 to vector<16x16xf32>
    %41 = arith.mulf %39, %40 : vector<16x16xf32>
    %42 = arith.addf %41, %1 : vector<16x16xf32>
    %cst_24 = arith.constant dense<0xFF800000> : vector<16xf32>
    %43 = vector.multi_reduction <maximumf>, %42, %cst_24 [1] : vector<16x16xf32> to vector<16xf32>
    %44 = vector.shape_cast %43 : vector<16xf32> to vector<16x1xf32>
    %45 = vector.broadcast %44 : vector<16x1xf32> to vector<16x16xf32>
    %46 = arith.subf %42, %45 : vector<16x16xf32>
    %47 = math.exp %46 : vector<16x16xf32>
    %cst_25 = arith.constant dense<0.000000e+00> : vector<16xf32>
    %48 = vector.multi_reduction <add>, %47, %cst_25 [1] : vector<16x16xf32> to vector<16xf32>
    %49 = vector.shape_cast %48 : vector<16xf32> to vector<16x1xf32>
    %50 = tpu.reciprocal %49 {approx = true} : vector<16x1xf32> -> vector<16x1xf32>
    %51 = vector.broadcast %50 : vector<16x1xf32> to vector<16x16xf32>
    %52 = arith.mulf %47, %51 : vector<16x16xf32>
    %cst_26 = arith.constant dense<0.000000e+00> : vector<16x8xf32>
    %53 = tpu.matmul %52, %38, %cst_26 {dimension_numbers = #tpu.dot_dimension_numbers<[1], [0], [0], [1], [0, 0, 1, 1], [], []>} : vector<16x16xf32>, vector<16x8xf32>, vector<16x8xf32> -> vector<16x8xf32>
    %54 = vector.extract_strided_slice %34 {offsets = [0, 0], sizes = [8, 32], strides = [1, 1]} : vector<32x32xf32> to vector<8x32xf32>
    %cst_27 = arith.constant dense<0.000000e+00> : vector<16x32xf32>
    %55 = tpu.matmul %53, %54, %cst_27 {dimension_numbers = #tpu.dot_dimension_numbers<[1], [0], [0], [1], [0, 0, 1, 1], [], []>} : vector<16x8xf32>, vector<8x32xf32>, vector<16x32xf32> -> vector<16x32xf32>
    %56 = arith.addf %35, %55 : vector<16x32xf32>
    %57 = vector.extract_strided_slice %32 {offsets = [0, 8], sizes = [16, 8], strides = [1, 1]} : vector<16x96xf32> to vector<16x8xf32>
    %58 = vector.extract_strided_slice %32 {offsets = [0, 40], sizes = [16, 8], strides = [1, 1]} : vector<16x96xf32> to vector<16x8xf32>
    %59 = vector.extract_strided_slice %32 {offsets = [0, 72], sizes = [16, 8], strides = [1, 1]} : vector<16x96xf32> to vector<16x8xf32>
    %cst_28 = arith.constant dense<0.000000e+00> : vector<16x16xf32>
    %60 = tpu.matmul %57, %58, %cst_28 {dimension_numbers = #tpu.dot_dimension_numbers<[1], [1], [0], [0], [0, 0, 1, 0], [], []>} : vector<16x8xf32>, vector<16x8xf32>, vector<16x16xf32> -> vector<16x16xf32>
    %cst_29 = arith.constant 0.353553385 : f32
    %61 = vector.broadcast %cst_29 : f32 to vector<16x16xf32>
    %62 = arith.mulf %60, %61 : vector<16x16xf32>
    %63 = arith.addf %62, %1 : vector<16x16xf32>
    %cst_30 = arith.constant dense<0xFF800000> : vector<16xf32>
    %64 = vector.multi_reduction <maximumf>, %63, %cst_30 [1] : vector<16x16xf32> to vector<16xf32>
    %65 = vector.shape_cast %64 : vector<16xf32> to vector<16x1xf32>
    %66 = vector.broadcast %65 : vector<16x1xf32> to vector<16x16xf32>
    %67 = arith.subf %63, %66 : vector<16x16xf32>
    %68 = math.exp %67 : vector<16x16xf32>
    %cst_31 = arith.constant dense<0.000000e+00> : vector<16xf32>
    %69 = vector.multi_reduction <add>, %68, %cst_31 [1] : vector<16x16xf32> to vector<16xf32>
    %70 = vector.shape_cast %69 : vector<16xf32> to vector<16x1xf32>
    %71 = tpu.reciprocal %70 {approx = true} : vector<16x1xf32> -> vector<16x1xf32>
    %72 = vector.broadcast %71 : vector<16x1xf32> to vector<16x16xf32>
    %73 = arith.mulf %68, %72 : vector<16x16xf32>
    %cst_32 = arith.constant dense<0.000000e+00> : vector<16x8xf32>
    %74 = tpu.matmul %73, %59, %cst_32 {dimension_numbers = #tpu.dot_dimension_numbers<[1], [0], [0], [1], [0, 0, 1, 1], [], []>} : vector<16x16xf32>, vector<16x8xf32>, vector<16x8xf32> -> vector<16x8xf32>
    %75 = vector.extract_strided_slice %34 {offsets = [8, 0], sizes = [8, 32], strides = [1, 1]} : vector<32x32xf32> to vector<8x32xf32>
    %cst_33 = arith.constant dense<0.000000e+00> : vector<16x32xf32>
    %76 = tpu.matmul %74, %75, %cst_33 {dimension_numbers = #tpu.dot_dimension_numbers<[1], [0], [0], [1], [0, 0, 1, 1], [], []>} : vector<16x8xf32>, vector<8x32xf32>, vector<16x32xf32> -> vector<16x32xf32>
    %77 = arith.addf %56, %76 : vector<16x32xf32>
    %78 = vector.extract_strided_slice %32 {offsets = [0, 16], sizes = [16, 8], strides = [1, 1]} : vector<16x96xf32> to vector<16x8xf32>
    %79 = vector.extract_strided_slice %32 {offsets = [0, 48], sizes = [16, 8], strides = [1, 1]} : vector<16x96xf32> to vector<16x8xf32>
    %80 = vector.extract_strided_slice %32 {offsets = [0, 80], sizes = [16, 8], strides = [1, 1]} : vector<16x96xf32> to vector<16x8xf32>
    %cst_34 = arith.constant dense<0.000000e+00> : vector<16x16xf32>
    %81 = tpu.matmul %78, %79, %cst_34 {dimension_numbers = #tpu.dot_dimension_numbers<[1], [1], [0], [0], [0, 0, 1, 0], [], []>} : vector<16x8xf32>, vector<16x8xf32>, vector<16x16xf32> -> vector<16x16xf32>
    %cst_35 = arith.constant 0.353553385 : f32
    %82 = vector.broadcast %cst_35 : f32 to vector<16x16xf32>
    %83 = arith.mulf %81, %82 : vector<16x16xf32>
    %84 = arith.addf %83, %1 : vector<16x16xf32>
    %cst_36 = arith.constant dense<0xFF800000> : vector<16xf32>
    %85 = vector.multi_reduction <maximumf>, %84, %cst_36 [1] : vector<16x16xf32> to vector<16xf32>
    %86 = vector.shape_cast %85 : vector<16xf32> to vector<16x1xf32>
    %87 = vector.broadcast %86 : vector<16x1xf32> to vector<16x16xf32>
    %88 = arith.subf %84, %87 : vector<16x16xf32>
    %89 = math.exp %88 : vector<16x16xf32>
    %cst_37 = arith.constant dense<0.000000e+00> : vector<16xf32>
    %90 = vector.multi_reduction <add>, %89, %cst_37 [1] : vector<16x16xf32> to vector<16xf32>
    %91 = vector.shape_cast %90 : vector<16xf32> to vector<16x1xf32>
    %92 = tpu.reciprocal %91 {approx = true} : vector<16x1xf32> -> vector<16x1xf32>
    %93 = vector.broadcast %92 : vector<16x1xf32> to vector<16x16xf32>
    %94 = arith.mulf %89, %93 : vector<16x16xf32>
    %cst_38 = arith.constant dense<0.000000e+00> : vector<16x8xf32>
    %95 = tpu.matmul %94, %80, %cst_38 {dimension_numbers = #tpu.dot_dimension_numbers<[1], [0], [0], [1], [0, 0, 1, 1], [], []>} : vector<16x16xf32>, vector<16x8xf32>, vector<16x8xf32> -> vector<16x8xf32>
    %96 = vector.extract_strided_slice %34 {offsets = [16, 0], sizes = [8, 32], strides = [1, 1]} : vector<32x32xf32> to vector<8x32xf32>
    %cst_39 = arith.constant dense<0.000000e+00> : vector<16x32xf32>
    %97 = tpu.matmul %95, %96, %cst_39 {dimension_numbers = #tpu.dot_dimension_numbers<[1], [0], [0], [1], [0, 0, 1, 1], [], []>} : vector<16x8xf32>, vector<8x32xf32>, vector<16x32xf32> -> vector<16x32xf32>
    %98 = arith.addf %77, %97 : vector<16x32xf32>
    %99 = vector.extract_strided_slice %32 {offsets = [0, 24], sizes = [16, 8], strides = [1, 1]} : vector<16x96xf32> to vector<16x8xf32>
    %100 = vector.extract_strided_slice %32 {offsets = [0, 56], sizes = [16, 8], strides = [1, 1]} : vector<16x96xf32> to vector<16x8xf32>
    %101 = vector.extract_strided_slice %32 {offsets = [0, 88], sizes = [16, 8], strides = [1, 1]} : vector<16x96xf32> to vector<16x8xf32>
    %cst_40 = arith.constant dense<0.000000e+00> : vector<16x16xf32>
    %102 = tpu.matmul %99, %100, %cst_40 {dimension_numbers = #tpu.dot_dimension_numbers<[1], [1], [0], [0], [0, 0, 1, 0], [], []>} : vector<16x8xf32>, vector<16x8xf32>, vector<16x16xf32> -> vector<16x16xf32>
    %cst_41 = arith.constant 0.353553385 : f32
    %103 = vector.broadcast %cst_41 : f32 to vector<16x16xf32>
    %104 = arith.mulf %102, %103 : vector<16x16xf32>
    %105 = arith.addf %104, %1 : vector<16x16xf32>
    %cst_42 = arith.constant dense<0xFF800000> : vector<16xf32>
    %106 = vector.multi_reduction <maximumf>, %105, %cst_42 [1] : vector<16x16xf32> to vector<16xf32>
    %107 = vector.shape_cast %106 : vector<16xf32> to vector<16x1xf32>
    %108 = vector.broadcast %107 : vector<16x1xf32> to vector<16x16xf32>
    %109 = arith.subf %105, %108 : vector<16x16xf32>
    %110 = math.exp %109 : vector<16x16xf32>
    %cst_43 = arith.constant dense<0.000000e+00> : vector<16xf32>
    %111 = vector.multi_reduction <add>, %110, %cst_43 [1] : vector<16x16xf32> to vector<16xf32>
    %112 = vector.shape_cast %111 : vector<16xf32> to vector<16x1xf32>
    %113 = tpu.reciprocal %112 {approx = true} : vector<16x1xf32> -> vector<16x1xf32>
    %114 = vector.broadcast %113 : vector<16x1xf32> to vector<16x16xf32>
    %115 = arith.mulf %110, %114 : vector<16x16xf32>
    %cst_44 = arith.constant dense<0.000000e+00> : vector<16x8xf32>
    %116 = tpu.matmul %115, %101, %cst_44 {dimension_numbers = #tpu.dot_dimension_numbers<[1], [0], [0], [1], [0, 0, 1, 1], [], []>} : vector<16x16xf32>, vector<16x8xf32>, vector<16x8xf32> -> vector<16x8xf32>
    %117 = vector.extract_strided_slice %34 {offsets = [24, 0], sizes = [8, 32], strides = [1, 1]} : vector<32x32xf32> to vector<8x32xf32>
    %cst_45 = arith.constant dense<0.000000e+00> : vector<16x32xf32>
    %118 = tpu.matmul %116, %117, %cst_45 {dimension_numbers = #tpu.dot_dimension_numbers<[1], [0], [0], [1], [0, 0, 1, 1], [], []>} : vector<16x8xf32>, vector<8x32xf32>, vector<16x32xf32> -> vector<16x32xf32>
    %119 = arith.addf %98, %118 : vector<16x32xf32>
    %c0_46 = arith.constant 0 : index
    %c0_47 = arith.constant 0 : index
    %c0_48 = arith.constant 0 : index
    %120 = vector.load %arg7[%c0_46, %c0_47, %c0_48] : memref<2x1x32xf32, #tpu.memory_space<vmem>>, vector<1x1x32xf32>
    %121 = vector.shape_cast %120 : vector<1x1x32xf32> to vector<1x32xf32>
    %122 = vector.broadcast %121 : vector<1x32xf32> to vector<16x32xf32>
    %123 = arith.addf %119, %122 : vector<16x32xf32>
    %124 = arith.addf %123, %25 : vector<16x32xf32>
    %c0_49 = arith.constant 0 : index
    %c0_50 = arith.constant 0 : index
    %c0_51 = arith.constant 0 : index
    %125 = vector.load %arg8[%c0_49, %c0_50, %c0_51] : memref<2x1x32xf32, #tpu.memory_space<vmem>>, vector<1x1x32xf32>
    %126 = vector.shape_cast %125 : vector<1x1x32xf32> to vector<1x32xf32>
    %c0_52 = arith.constant 0 : index
    %c0_53 = arith.constant 0 : index
    %c0_54 = arith.constant 0 : index
    %127 = vector.load %arg9[%c0_52, %c0_53, %c0_54] : memref<2x1x32xf32, #tpu.memory_space<vmem>>, vector<1x1x32xf32>
    %128 = vector.shape_cast %127 : vector<1x1x32xf32> to vector<1x32xf32>
    %cst_55 = arith.constant dense<0.000000e+00> : vector<16xf32>
    %129 = vector.multi_reduction <add>, %124, %cst_55 [1] : vector<16x32xf32> to vector<16xf32>
    %130 = vector.shape_cast %129 : vector<16xf32> to vector<16x1xf32>
    %cst_56 = arith.constant 3.200000e+01 : f32
    %131 = vector.broadcast %cst_56 : f32 to vector<16x1xf32>
    %132 = arith.divf %130, %131 : vector<16x1xf32>
    %133 = vector.broadcast %132 : vector<16x1xf32> to vector<16x32xf32>
    %134 = arith.subf %124, %133 : vector<16x32xf32>
    %135 = arith.mulf %134, %134 : vector<16x32xf32>
    %cst_57 = arith.constant dense<0.000000e+00> : vector<16xf32>
    %136 = vector.multi_reduction <add>, %135, %cst_57 [1] : vector<16x32xf32> to vector<16xf32>
    %137 = vector.shape_cast %136 : vector<16xf32> to vector<16x1xf32>
    %cst_58 = arith.constant 3.200000e+01 : f32
    %138 = vector.broadcast %cst_58 : f32 to vector<16x1xf32>
    %139 = arith.divf %137, %138 : vector<16x1xf32>
    %140 = vector.broadcast %132 : vector<16x1xf32> to vector<16x32xf32>
    %141 = arith.subf %124, %140 : vector<16x32xf32>
    %cst_59 = arith.constant 9.99999974E-6 : f32
    %142 = vector.broadcast %cst_59 : f32 to vector<16x1xf32>
    %143 = arith.addf %139, %142 : vector<16x1xf32>
    %144 = math.rsqrt %143 : vector<16x1xf32>
    %145 = vector.broadcast %144 : vector<16x1xf32> to vector<16x32xf32>
    %146 = arith.mulf %141, %145 : vector<16x32xf32>
    %147 = vector.broadcast %126 : vector<1x32xf32> to vector<16x32xf32>
    %148 = arith.mulf %146, %147 : vector<16x32xf32>
    %149 = vector.broadcast %128 : vector<1x32xf32> to vector<16x32xf32>
    %150 = arith.addf %148, %149 : vector<16x32xf32>
    %c0_60 = arith.constant 0 : index
    %c0_61 = arith.constant 0 : index
    %c0_62 = arith.constant 0 : index
    %151 = vector.load %arg10[%c0_60, %c0_61, %c0_62] : memref<2x32x64xf32, #tpu.memory_space<vmem>>, vector<1x32x64xf32>
    %152 = vector.shape_cast %151 : vector<1x32x64xf32> to vector<32x64xf32>
    %cst_63 = arith.constant dense<0.000000e+00> : vector<16x64xf32>
    %153 = tpu.matmul %150, %152, %cst_63 {dimension_numbers = #tpu.dot_dimension_numbers<[1], [0], [0], [1], [0, 0, 1, 1], [], []>} : vector<16x32xf32>, vector<32x64xf32>, vector<16x64xf32> -> vector<16x64xf32>
    %c0_64 = arith.constant 0 : index
    %c0_65 = arith.constant 0 : index
    %c0_66 = arith.constant 0 : index
    %154 = vector.load %arg11[%c0_64, %c0_65, %c0_66] : memref<2x1x64xf32, #tpu.memory_space<vmem>>, vector<1x1x64xf32>
    %155 = vector.shape_cast %154 : vector<1x1x64xf32> to vector<1x64xf32>
    %156 = vector.broadcast %155 : vector<1x64xf32> to vector<16x64xf32>
    %157 = arith.addf %153, %156 : vector<16x64xf32>
    %cst_67 = arith.constant 5.000000e-01 : f32
    %158 = vector.broadcast %cst_67 : f32 to vector<16x64xf32>
    %159 = arith.mulf %158, %157 : vector<16x64xf32>
    %cst_68 = arith.constant 0.707106769 : f32
    %160 = vector.broadcast %cst_68 : f32 to vector<16x64xf32>
    %161 = arith.mulf %157, %160 : vector<16x64xf32>
    %162 = math.erf %161 : vector<16x64xf32>
    %cst_69 = arith.constant 1.000000e+00 : f32
    %163 = vector.broadcast %cst_69 : f32 to vector<16x64xf32>
    %164 = arith.addf %163, %162 : vector<16x64xf32>
    %165 = arith.mulf %159, %164 : vector<16x64xf32>
    %c0_70 = arith.constant 0 : index
    %c0_71 = arith.constant 0 : index
    %c0_72 = arith.constant 0 : index
    %166 = vector.load %arg12[%c0_70, %c0_71, %c0_72] : memref<2x64x32xf32, #tpu.memory_space<vmem>>, vector<1x64x32xf32>
    %167 = vector.shape_cast %166 : vector<1x64x32xf32> to vector<64x32xf32>
    %cst_73 = arith.constant dense<0.000000e+00> : vector<16x32xf32>
    %168 = tpu.matmul %165, %167, %cst_73 {dimension_numbers = #tpu.dot_dimension_numbers<[1], [0], [0], [1], [0, 0, 1, 1], [], []>} : vector<16x64xf32>, vector<64x32xf32>, vector<16x32xf32> -> vector<16x32xf32>
    %c0_74 = arith.constant 0 : index
    %c0_75 = arith.constant 0 : index
    %c0_76 = arith.constant 0 : index
    %169 = vector.load %arg13[%c0_74, %c0_75, %c0_76] : memref<2x1x32xf32, #tpu.memory_space<vmem>>, vector<1x1x32xf32>
    %170 = vector.shape_cast %169 : vector<1x1x32xf32> to vector<1x32xf32>
    %171 = vector.broadcast %170 : vector<1x32xf32> to vector<16x32xf32>
    %172 = arith.addf %168, %171 : vector<16x32xf32>
    %173 = arith.addf %172, %150 : vector<16x32xf32>
    %c0_77 = arith.constant 0 : index
    %c0_78 = arith.constant 0 : index
    %c0_79 = arith.constant 0 : index
    %174 = vector.load %arg14[%c0_77, %c0_78, %c0_79] : memref<2x1x32xf32, #tpu.memory_space<vmem>>, vector<1x1x32xf32>
    %175 = vector.shape_cast %174 : vector<1x1x32xf32> to vector<1x32xf32>
    %c0_80 = arith.constant 0 : index
    %c0_81 = arith.constant 0 : index
    %c0_82 = arith.constant 0 : index
    %176 = vector.load %arg15[%c0_80, %c0_81, %c0_82] : memref<2x1x32xf32, #tpu.memory_space<vmem>>, vector<1x1x32xf32>
    %177 = vector.shape_cast %176 : vector<1x1x32xf32> to vector<1x32xf32>
    %cst_83 = arith.constant dense<0.000000e+00> : vector<16xf32>
    %178 = vector.multi_reduction <add>, %173, %cst_83 [1] : vector<16x32xf32> to vector<16xf32>
    %179 = vector.shape_cast %178 : vector<16xf32> to vector<16x1xf32>
    %cst_84 = arith.constant 3.200000e+01 : f32
    %180 = vector.broadcast %cst_84 : f32 to vector<16x1xf32>
    %181 = arith.divf %179, %180 : vector<16x1xf32>
    %182 = vector.broadcast %181 : vector<16x1xf32> to vector<16x32xf32>
    %183 = arith.subf %173, %182 : vector<16x32xf32>
    %184 = arith.mulf %183, %183 : vector<16x32xf32>
    %cst_85 = arith.constant dense<0.000000e+00> : vector<16xf32>
    %185 = vector.multi_reduction <add>, %184, %cst_85 [1] : vector<16x32xf32> to vector<16xf32>
    %186 = vector.shape_cast %185 : vector<16xf32> to vector<16x1xf32>
    %cst_86 = arith.constant 3.200000e+01 : f32
    %187 = vector.broadcast %cst_86 : f32 to vector<16x1xf32>
    %188 = arith.divf %186, %187 : vector<16x1xf32>
    %189 = vector.broadcast %181 : vector<16x1xf32> to vector<16x32xf32>
    %190 = arith.subf %173, %189 : vector<16x32xf32>
    %cst_87 = arith.constant 9.99999974E-6 : f32
    %191 = vector.broadcast %cst_87 : f32 to vector<16x1xf32>
    %192 = arith.addf %188, %191 : vector<16x1xf32>
    %193 = math.rsqrt %192 : vector<16x1xf32>
    %194 = vector.broadcast %193 : vector<16x1xf32> to vector<16x32xf32>
    %195 = arith.mulf %190, %194 : vector<16x32xf32>
    %196 = vector.broadcast %175 : vector<1x32xf32> to vector<16x32xf32>
    %197 = arith.mulf %195, %196 : vector<16x32xf32>
    %198 = vector.broadcast %177 : vector<1x32xf32> to vector<16x32xf32>
    %199 = arith.addf %197, %198 : vector<16x32xf32>
    %c1 = arith.constant 1 : index
    %c0_88 = arith.constant 0 : index
    %c0_89 = arith.constant 0 : index
    %200 = vector.load %arg4[%c1, %c0_88, %c0_89] : memref<2x32x96xf32, #tpu.memory_space<vmem>>, vector<1x32x96xf32>
    %201 = vector.shape_cast %200 : vector<1x32x96xf32> to vector<32x96xf32>
    %cst_90 = arith.constant dense<0.000000e+00> : vector<16x96xf32>
    %202 = tpu.matmul %199, %201, %cst_90 {dimension_numbers = #tpu.dot_dimension_numbers<[1], [0], [0], [1], [0, 0, 1, 1], [], []>} : vector<16x32xf32>, vector<32x96xf32>, vector<16x96xf32> -> vector<16x96xf32>
    %c1_91 = arith.constant 1 : index
    %c0_92 = arith.constant 0 : index
    %c0_93 = arith.constant 0 : index
    %203 = vector.load %arg5[%c1_91, %c0_92, %c0_93] : memref<2x1x96xf32, #tpu.memory_space<vmem>>, vector<1x1x96xf32>
    %204 = vector.shape_cast %203 : vector<1x1x96xf32> to vector<1x96xf32>
    %205 = vector.broadcast %204 : vector<1x96xf32> to vector<16x96xf32>
    %206 = arith.addf %202, %205 : vector<16x96xf32>
    %c1_94 = arith.constant 1 : index
    %c0_95 = arith.constant 0 : index
    %c0_96 = arith.constant 0 : index
    %207 = vector.load %arg6[%c1_94, %c0_95, %c0_96] : memref<2x32x32xf32, #tpu.memory_space<vmem>>, vector<1x32x32xf32>
    %208 = vector.shape_cast %207 : vector<1x32x32xf32> to vector<32x32xf32>
    %cst_97 = arith.constant 0.000000e+00 : f32
    %209 = vector.broadcast %cst_97 : f32 to vector<16x32xf32>
    %210 = vector.extract_strided_slice %206 {offsets = [0, 0], sizes = [16, 8], strides = [1, 1]} : vector<16x96xf32> to vector<16x8xf32>
    %211 = vector.extract_strided_slice %206 {offsets = [0, 32], sizes = [16, 8], strides = [1, 1]} : vector<16x96xf32> to vector<16x8xf32>
    %212 = vector.extract_strided_slice %206 {offsets = [0, 64], sizes = [16, 8], strides = [1, 1]} : vector<16x96xf32> to vector<16x8xf32>
    %cst_98 = arith.constant dense<0.000000e+00> : vector<16x16xf32>
    %213 = tpu.matmul %210, %211, %cst_98 {dimension_numbers = #tpu.dot_dimension_numbers<[1], [1], [0], [0], [0, 0, 1, 0], [], []>} : vector<16x8xf32>, vector<16x8xf32>, vector<16x16xf32> -> vector<16x16xf32>
    %cst_99 = arith.constant 0.353553385 : f32
    %214 = vector.broadcast %cst_99 : f32 to vector<16x16xf32>
    %215 = arith.mulf %213, %214 : vector<16x16xf32>
    %216 = arith.addf %215, %1 : vector<16x16xf32>
    %cst_100 = arith.constant dense<0xFF800000> : vector<16xf32>
    %217 = vector.multi_reduction <maximumf>, %216, %cst_100 [1] : vector<16x16xf32> to vector<16xf32>
    %218 = vector.shape_cast %217 : vector<16xf32> to vector<16x1xf32>
    %219 = vector.broadcast %218 : vector<16x1xf32> to vector<16x16xf32>
    %220 = arith.subf %216, %219 : vector<16x16xf32>
    %221 = math.exp %220 : vector<16x16xf32>
    %cst_101 = arith.constant dense<0.000000e+00> : vector<16xf32>
    %222 = vector.multi_reduction <add>, %221, %cst_101 [1] : vector<16x16xf32> to vector<16xf32>
    %223 = vector.shape_cast %222 : vector<16xf32> to vector<16x1xf32>
    %224 = tpu.reciprocal %223 {approx = true} : vector<16x1xf32> -> vector<16x1xf32>
    %225 = vector.broadcast %224 : vector<16x1xf32> to vector<16x16xf32>
    %226 = arith.mulf %221, %225 : vector<16x16xf32>
    %cst_102 = arith.constant dense<0.000000e+00> : vector<16x8xf32>
    %227 = tpu.matmul %226, %212, %cst_102 {dimension_numbers = #tpu.dot_dimension_numbers<[1], [0], [0], [1], [0, 0, 1, 1], [], []>} : vector<16x16xf32>, vector<16x8xf32>, vector<16x8xf32> -> vector<16x8xf32>
    %228 = vector.extract_strided_slice %208 {offsets = [0, 0], sizes = [8, 32], strides = [1, 1]} : vector<32x32xf32> to vector<8x32xf32>
    %cst_103 = arith.constant dense<0.000000e+00> : vector<16x32xf32>
    %229 = tpu.matmul %227, %228, %cst_103 {dimension_numbers = #tpu.dot_dimension_numbers<[1], [0], [0], [1], [0, 0, 1, 1], [], []>} : vector<16x8xf32>, vector<8x32xf32>, vector<16x32xf32> -> vector<16x32xf32>
    %230 = arith.addf %209, %229 : vector<16x32xf32>
    %231 = vector.extract_strided_slice %206 {offsets = [0, 8], sizes = [16, 8], strides = [1, 1]} : vector<16x96xf32> to vector<16x8xf32>
    %232 = vector.extract_strided_slice %206 {offsets = [0, 40], sizes = [16, 8], strides = [1, 1]} : vector<16x96xf32> to vector<16x8xf32>
    %233 = vector.extract_strided_slice %206 {offsets = [0, 72], sizes = [16, 8], strides = [1, 1]} : vector<16x96xf32> to vector<16x8xf32>
    %cst_104 = arith.constant dense<0.000000e+00> : vector<16x16xf32>
    %234 = tpu.matmul %231, %232, %cst_104 {dimension_numbers = #tpu.dot_dimension_numbers<[1], [1], [0], [0], [0, 0, 1, 0], [], []>} : vector<16x8xf32>, vector<16x8xf32>, vector<16x16xf32> -> vector<16x16xf32>
    %cst_105 = arith.constant 0.353553385 : f32
    %235 = vector.broadcast %cst_105 : f32 to vector<16x16xf32>
    %236 = arith.mulf %234, %235 : vector<16x16xf32>
    %237 = arith.addf %236, %1 : vector<16x16xf32>
    %cst_106 = arith.constant dense<0xFF800000> : vector<16xf32>
    %238 = vector.multi_reduction <maximumf>, %237, %cst_106 [1] : vector<16x16xf32> to vector<16xf32>
    %239 = vector.shape_cast %238 : vector<16xf32> to vector<16x1xf32>
    %240 = vector.broadcast %239 : vector<16x1xf32> to vector<16x16xf32>
    %241 = arith.subf %237, %240 : vector<16x16xf32>
    %242 = math.exp %241 : vector<16x16xf32>
    %cst_107 = arith.constant dense<0.000000e+00> : vector<16xf32>
    %243 = vector.multi_reduction <add>, %242, %cst_107 [1] : vector<16x16xf32> to vector<16xf32>
    %244 = vector.shape_cast %243 : vector<16xf32> to vector<16x1xf32>
    %245 = tpu.reciprocal %244 {approx = true} : vector<16x1xf32> -> vector<16x1xf32>
    %246 = vector.broadcast %245 : vector<16x1xf32> to vector<16x16xf32>
    %247 = arith.mulf %242, %246 : vector<16x16xf32>
    %cst_108 = arith.constant dense<0.000000e+00> : vector<16x8xf32>
    %248 = tpu.matmul %247, %233, %cst_108 {dimension_numbers = #tpu.dot_dimension_numbers<[1], [0], [0], [1], [0, 0, 1, 1], [], []>} : vector<16x16xf32>, vector<16x8xf32>, vector<16x8xf32> -> vector<16x8xf32>
    %249 = vector.extract_strided_slice %208 {offsets = [8, 0], sizes = [8, 32], strides = [1, 1]} : vector<32x32xf32> to vector<8x32xf32>
    %cst_109 = arith.constant dense<0.000000e+00> : vector<16x32xf32>
    %250 = tpu.matmul %248, %249, %cst_109 {dimension_numbers = #tpu.dot_dimension_numbers<[1], [0], [0], [1], [0, 0, 1, 1], [], []>} : vector<16x8xf32>, vector<8x32xf32>, vector<16x32xf32> -> vector<16x32xf32>
    %251 = arith.addf %230, %250 : vector<16x32xf32>
    %252 = vector.extract_strided_slice %206 {offsets = [0, 16], sizes = [16, 8], strides = [1, 1]} : vector<16x96xf32> to vector<16x8xf32>
    %253 = vector.extract_strided_slice %206 {offsets = [0, 48], sizes = [16, 8], strides = [1, 1]} : vector<16x96xf32> to vector<16x8xf32>
    %254 = vector.extract_strided_slice %206 {offsets = [0, 80], sizes = [16, 8], strides = [1, 1]} : vector<16x96xf32> to vector<16x8xf32>
    %cst_110 = arith.constant dense<0.000000e+00> : vector<16x16xf32>
    %255 = tpu.matmul %252, %253, %cst_110 {dimension_numbers = #tpu.dot_dimension_numbers<[1], [1], [0], [0], [0, 0, 1, 0], [], []>} : vector<16x8xf32>, vector<16x8xf32>, vector<16x16xf32> -> vector<16x16xf32>
    %cst_111 = arith.constant 0.353553385 : f32
    %256 = vector.broadcast %cst_111 : f32 to vector<16x16xf32>
    %257 = arith.mulf %255, %256 : vector<16x16xf32>
    %258 = arith.addf %257, %1 : vector<16x16xf32>
    %cst_112 = arith.constant dense<0xFF800000> : vector<16xf32>
    %259 = vector.multi_reduction <maximumf>, %258, %cst_112 [1] : vector<16x16xf32> to vector<16xf32>
    %260 = vector.shape_cast %259 : vector<16xf32> to vector<16x1xf32>
    %261 = vector.broadcast %260 : vector<16x1xf32> to vector<16x16xf32>
    %262 = arith.subf %258, %261 : vector<16x16xf32>
    %263 = math.exp %262 : vector<16x16xf32>
    %cst_113 = arith.constant dense<0.000000e+00> : vector<16xf32>
    %264 = vector.multi_reduction <add>, %263, %cst_113 [1] : vector<16x16xf32> to vector<16xf32>
    %265 = vector.shape_cast %264 : vector<16xf32> to vector<16x1xf32>
    %266 = tpu.reciprocal %265 {approx = true} : vector<16x1xf32> -> vector<16x1xf32>
    %267 = vector.broadcast %266 : vector<16x1xf32> to vector<16x16xf32>
    %268 = arith.mulf %263, %267 : vector<16x16xf32>
    %cst_114 = arith.constant dense<0.000000e+00> : vector<16x8xf32>
    %269 = tpu.matmul %268, %254, %cst_114 {dimension_numbers = #tpu.dot_dimension_numbers<[1], [0], [0], [1], [0, 0, 1, 1], [], []>} : vector<16x16xf32>, vector<16x8xf32>, vector<16x8xf32> -> vector<16x8xf32>
    %270 = vector.extract_strided_slice %208 {offsets = [16, 0], sizes = [8, 32], strides = [1, 1]} : vector<32x32xf32> to vector<8x32xf32>
    %cst_115 = arith.constant dense<0.000000e+00> : vector<16x32xf32>
    %271 = tpu.matmul %269, %270, %cst_115 {dimension_numbers = #tpu.dot_dimension_numbers<[1], [0], [0], [1], [0, 0, 1, 1], [], []>} : vector<16x8xf32>, vector<8x32xf32>, vector<16x32xf32> -> vector<16x32xf32>
    %272 = arith.addf %251, %271 : vector<16x32xf32>
    %273 = vector.extract_strided_slice %206 {offsets = [0, 24], sizes = [16, 8], strides = [1, 1]} : vector<16x96xf32> to vector<16x8xf32>
    %274 = vector.extract_strided_slice %206 {offsets = [0, 56], sizes = [16, 8], strides = [1, 1]} : vector<16x96xf32> to vector<16x8xf32>
    %275 = vector.extract_strided_slice %206 {offsets = [0, 88], sizes = [16, 8], strides = [1, 1]} : vector<16x96xf32> to vector<16x8xf32>
    %cst_116 = arith.constant dense<0.000000e+00> : vector<16x16xf32>
    %276 = tpu.matmul %273, %274, %cst_116 {dimension_numbers = #tpu.dot_dimension_numbers<[1], [1], [0], [0], [0, 0, 1, 0], [], []>} : vector<16x8xf32>, vector<16x8xf32>, vector<16x16xf32> -> vector<16x16xf32>
    %cst_117 = arith.constant 0.353553385 : f32
    %277 = vector.broadcast %cst_117 : f32 to vector<16x16xf32>
    %278 = arith.mulf %276, %277 : vector<16x16xf32>
    %279 = arith.addf %278, %1 : vector<16x16xf32>
    %cst_118 = arith.constant dense<0xFF800000> : vector<16xf32>
    %280 = vector.multi_reduction <maximumf>, %279, %cst_118 [1] : vector<16x16xf32> to vector<16xf32>
    %281 = vector.shape_cast %280 : vector<16xf32> to vector<16x1xf32>
    %282 = vector.broadcast %281 : vector<16x1xf32> to vector<16x16xf32>
    %283 = arith.subf %279, %282 : vector<16x16xf32>
    %284 = math.exp %283 : vector<16x16xf32>
    %cst_119 = arith.constant dense<0.000000e+00> : vector<16xf32>
    %285 = vector.multi_reduction <add>, %284, %cst_119 [1] : vector<16x16xf32> to vector<16xf32>
    %286 = vector.shape_cast %285 : vector<16xf32> to vector<16x1xf32>
    %287 = tpu.reciprocal %286 {approx = true} : vector<16x1xf32> -> vector<16x1xf32>
    %288 = vector.broadcast %287 : vector<16x1xf32> to vector<16x16xf32>
    %289 = arith.mulf %284, %288 : vector<16x16xf32>
    %cst_120 = arith.constant dense<0.000000e+00> : vector<16x8xf32>
    %290 = tpu.matmul %289, %275, %cst_120 {dimension_numbers = #tpu.dot_dimension_numbers<[1], [0], [0], [1], [0, 0, 1, 1], [], []>} : vector<16x16xf32>, vector<16x8xf32>, vector<16x8xf32> -> vector<16x8xf32>
    %291 = vector.extract_strided_slice %208 {offsets = [24, 0], sizes = [8, 32], strides = [1, 1]} : vector<32x32xf32> to vector<8x32xf32>
    %cst_121 = arith.constant dense<0.000000e+00> : vector<16x32xf32>
    %292 = tpu.matmul %290, %291, %cst_121 {dimension_numbers = #tpu.dot_dimension_numbers<[1], [0], [0], [1], [0, 0, 1, 1], [], []>} : vector<16x8xf32>, vector<8x32xf32>, vector<16x32xf32> -> vector<16x32xf32>
    %293 = arith.addf %272, %292 : vector<16x32xf32>
    %c1_122 = arith.constant 1 : index
    %c0_123 = arith.constant 0 : index
    %c0_124 = arith.constant 0 : index
    %294 = vector.load %arg7[%c1_122, %c0_123, %c0_124] : memref<2x1x32xf32, #tpu.memory_space<vmem>>, vector<1x1x32xf32>
    %295 = vector.shape_cast %294 : vector<1x1x32xf32> to vector<1x32xf32>
    %296 = vector.broadcast %295 : vector<1x32xf32> to vector<16x32xf32>
    %297 = arith.addf %293, %296 : vector<16x32xf32>
    %298 = arith.addf %297, %199 : vector<16x32xf32>
    %c1_125 = arith.constant 1 : index
    %c0_126 = arith.constant 0 : index
    %c0_127 = arith.constant 0 : index
    %299 = vector.load %arg8[%c1_125, %c0_126, %c0_127] : memref<2x1x32xf32, #tpu.memory_space<vmem>>, vector<1x1x32xf32>
    %300 = vector.shape_cast %299 : vector<1x1x32xf32> to vector<1x32xf32>
    %c1_128 = arith.constant 1 : index
    %c0_129 = arith.constant 0 : index
    %c0_130 = arith.constant 0 : index
    %301 = vector.load %arg9[%c1_128, %c0_129, %c0_130] : memref<2x1x32xf32, #tpu.memory_space<vmem>>, vector<1x1x32xf32>
    %302 = vector.shape_cast %301 : vector<1x1x32xf32> to vector<1x32xf32>
    %cst_131 = arith.constant dense<0.000000e+00> : vector<16xf32>
    %303 = vector.multi_reduction <add>, %298, %cst_131 [1] : vector<16x32xf32> to vector<16xf32>
    %304 = vector.shape_cast %303 : vector<16xf32> to vector<16x1xf32>
    %cst_132 = arith.constant 3.200000e+01 : f32
    %305 = vector.broadcast %cst_132 : f32 to vector<16x1xf32>
    %306 = arith.divf %304, %305 : vector<16x1xf32>
    %307 = vector.broadcast %306 : vector<16x1xf32> to vector<16x32xf32>
    %308 = arith.subf %298, %307 : vector<16x32xf32>
    %309 = arith.mulf %308, %308 : vector<16x32xf32>
    %cst_133 = arith.constant dense<0.000000e+00> : vector<16xf32>
    %310 = vector.multi_reduction <add>, %309, %cst_133 [1] : vector<16x32xf32> to vector<16xf32>
    %311 = vector.shape_cast %310 : vector<16xf32> to vector<16x1xf32>
    %cst_134 = arith.constant 3.200000e+01 : f32
    %312 = vector.broadcast %cst_134 : f32 to vector<16x1xf32>
    %313 = arith.divf %311, %312 : vector<16x1xf32>
    %314 = vector.broadcast %306 : vector<16x1xf32> to vector<16x32xf32>
    %315 = arith.subf %298, %314 : vector<16x32xf32>
    %cst_135 = arith.constant 9.99999974E-6 : f32
    %316 = vector.broadcast %cst_135 : f32 to vector<16x1xf32>
    %317 = arith.addf %313, %316 : vector<16x1xf32>
    %318 = math.rsqrt %317 : vector<16x1xf32>
    %319 = vector.broadcast %318 : vector<16x1xf32> to vector<16x32xf32>
    %320 = arith.mulf %315, %319 : vector<16x32xf32>
    %321 = vector.broadcast %300 : vector<1x32xf32> to vector<16x32xf32>
    %322 = arith.mulf %320, %321 : vector<16x32xf32>
    %323 = vector.broadcast %302 : vector<1x32xf32> to vector<16x32xf32>
    %324 = arith.addf %322, %323 : vector<16x32xf32>
    %c1_136 = arith.constant 1 : index
    %c0_137 = arith.constant 0 : index
    %c0_138 = arith.constant 0 : index
    %325 = vector.load %arg10[%c1_136, %c0_137, %c0_138] : memref<2x32x64xf32, #tpu.memory_space<vmem>>, vector<1x32x64xf32>
    %326 = vector.shape_cast %325 : vector<1x32x64xf32> to vector<32x64xf32>
    %cst_139 = arith.constant dense<0.000000e+00> : vector<16x64xf32>
    %327 = tpu.matmul %324, %326, %cst_139 {dimension_numbers = #tpu.dot_dimension_numbers<[1], [0], [0], [1], [0, 0, 1, 1], [], []>} : vector<16x32xf32>, vector<32x64xf32>, vector<16x64xf32> -> vector<16x64xf32>
    %c1_140 = arith.constant 1 : index
    %c0_141 = arith.constant 0 : index
    %c0_142 = arith.constant 0 : index
    %328 = vector.load %arg11[%c1_140, %c0_141, %c0_142] : memref<2x1x64xf32, #tpu.memory_space<vmem>>, vector<1x1x64xf32>
    %329 = vector.shape_cast %328 : vector<1x1x64xf32> to vector<1x64xf32>
    %330 = vector.broadcast %329 : vector<1x64xf32> to vector<16x64xf32>
    %331 = arith.addf %327, %330 : vector<16x64xf32>
    %cst_143 = arith.constant 5.000000e-01 : f32
    %332 = vector.broadcast %cst_143 : f32 to vector<16x64xf32>
    %333 = arith.mulf %332, %331 : vector<16x64xf32>
    %cst_144 = arith.constant 0.707106769 : f32
    %334 = vector.broadcast %cst_144 : f32 to vector<16x64xf32>
    %335 = arith.mulf %331, %334 : vector<16x64xf32>
    %336 = math.erf %335 : vector<16x64xf32>
    %cst_145 = arith.constant 1.000000e+00 : f32
    %337 = vector.broadcast %cst_145 : f32 to vector<16x64xf32>
    %338 = arith.addf %337, %336 : vector<16x64xf32>
    %339 = arith.mulf %333, %338 : vector<16x64xf32>
    %c1_146 = arith.constant 1 : index
    %c0_147 = arith.constant 0 : index
    %c0_148 = arith.constant 0 : index
    %340 = vector.load %arg12[%c1_146, %c0_147, %c0_148] : memref<2x64x32xf32, #tpu.memory_space<vmem>>, vector<1x64x32xf32>
    %341 = vector.shape_cast %340 : vector<1x64x32xf32> to vector<64x32xf32>
    %cst_149 = arith.constant dense<0.000000e+00> : vector<16x32xf32>
    %342 = tpu.matmul %339, %341, %cst_149 {dimension_numbers = #tpu.dot_dimension_numbers<[1], [0], [0], [1], [0, 0, 1, 1], [], []>} : vector<16x64xf32>, vector<64x32xf32>, vector<16x32xf32> -> vector<16x32xf32>
    %c1_150 = arith.constant 1 : index
    %c0_151 = arith.constant 0 : index
    %c0_152 = arith.constant 0 : index
    %343 = vector.load %arg13[%c1_150, %c0_151, %c0_152] : memref<2x1x32xf32, #tpu.memory_space<vmem>>, vector<1x1x32xf32>
    %344 = vector.shape_cast %343 : vector<1x1x32xf32> to vector<1x32xf32>
    %345 = vector.broadcast %344 : vector<1x32xf32> to vector<16x32xf32>
    %346 = arith.addf %342, %345 : vector<16x32xf32>
    %347 = arith.addf %346, %324 : vector<16x32xf32>
    %c1_153 = arith.constant 1 : index
    %c0_154 = arith.constant 0 : index
    %c0_155 = arith.constant 0 : index
    %348 = vector.load %arg14[%c1_153, %c0_154, %c0_155] : memref<2x1x32xf32, #tpu.memory_space<vmem>>, vector<1x1x32xf32>
    %349 = vector.shape_cast %348 : vector<1x1x32xf32> to vector<1x32xf32>
    %c1_156 = arith.constant 1 : index
    %c0_157 = arith.constant 0 : index
    %c0_158 = arith.constant 0 : index
    %350 = vector.load %arg15[%c1_156, %c0_157, %c0_158] : memref<2x1x32xf32, #tpu.memory_space<vmem>>, vector<1x1x32xf32>
    %351 = vector.shape_cast %350 : vector<1x1x32xf32> to vector<1x32xf32>
    %cst_159 = arith.constant dense<0.000000e+00> : vector<16xf32>
    %352 = vector.multi_reduction <add>, %347, %cst_159 [1] : vector<16x32xf32> to vector<16xf32>
    %353 = vector.shape_cast %352 : vector<16xf32> to vector<16x1xf32>
    %cst_160 = arith.constant 3.200000e+01 : f32
    %354 = vector.broadcast %cst_160 : f32 to vector<16x1xf32>
    %355 = arith.divf %353, %354 : vector<16x1xf32>
    %356 = vector.broadcast %355 : vector<16x1xf32> to vector<16x32xf32>
    %357 = arith.subf %347, %356 : vector<16x32xf32>
    %358 = arith.mulf %357, %357 : vector<16x32xf32>
    %cst_161 = arith.constant dense<0.000000e+00> : vector<16xf32>
    %359 = vector.multi_reduction <add>, %358, %cst_161 [1] : vector<16x32xf32> to vector<16xf32>
    %360 = vector.shape_cast %359 : vector<16xf32> to vector<16x1xf32>
    %cst_162 = arith.constant 3.200000e+01 : f32
    %361 = vector.broadcast %cst_162 : f32 to vector<16x1xf32>
    %362 = arith.divf %360, %361 : vector<16x1xf32>
    %363 = vector.broadcast %355 : vector<16x1xf32> to vector<16x32xf32>
    %364 = arith.subf %347, %363 : vector<16x32xf32>
    %cst_163 = arith.constant 9.99999974E-6 : f32
    %365 = vector.broadcast %cst_163 : f32 to vector<16x1xf32>
    %366 = arith.addf %362, %365 : vector<16x1xf32>
    %367 = math.rsqrt %366 : vector<16x1xf32>
    %368 = vector.broadcast %367 : vector<16x1xf32> to vector<16x32xf32>
    %369 = arith.mulf %364, %368 : vector<16x32xf32>
    %370 = vector.broadcast %349 : vector<1x32xf32> to vector<16x32xf32>
    %371 = arith.mulf %369, %370 : vector<16x32xf32>
    %372 = vector.broadcast %351 : vector<1x32xf32> to vector<16x32xf32>
    %373 = arith.addf %371, %372 : vector<16x32xf32>
    %c0_164 = arith.constant 0 : index
    %c0_165 = arith.constant 0 : index
    %374 = vector.load %arg16[%c0_164, %c0_165] : memref<32x16xf32, #tpu.memory_space<vmem>>, vector<32x16xf32>
    %cst_166 = arith.constant dense<0.000000e+00> : vector<16x16xf32>
    %375 = tpu.matmul %373, %374, %cst_166 {dimension_numbers = #tpu.dot_dimension_numbers<[1], [0], [0], [1], [0, 0, 1, 1], [], []>} : vector<16x32xf32>, vector<32x16xf32>, vector<16x16xf32> -> vector<16x16xf32>
    %c0_167 = arith.constant 0 : index
    %c0_168 = arith.constant 0 : index
    %376 = vector.load %arg17[%c0_167, %c0_168] : memref<1x16xf32, #tpu.memory_space<vmem>>, vector<1x16xf32>
    %377 = vector.broadcast %376 : vector<1x16xf32> to vector<16x16xf32>
    %378 = arith.addf %375, %377 : vector<16x16xf32>
    %cst_169 = arith.constant 5.000000e-01 : f32
    %379 = vector.broadcast %cst_169 : f32 to vector<16x16xf32>
    %380 = arith.mulf %379, %378 : vector<16x16xf32>
    %cst_170 = arith.constant 0.707106769 : f32
    %381 = vector.broadcast %cst_170 : f32 to vector<16x16xf32>
    %382 = arith.mulf %378, %381 : vector<16x16xf32>
    %383 = math.erf %382 : vector<16x16xf32>
    %cst_171 = arith.constant 1.000000e+00 : f32
    %384 = vector.broadcast %cst_171 : f32 to vector<16x16xf32>
    %385 = arith.addf %384, %383 : vector<16x16xf32>
    %386 = arith.mulf %380, %385 : vector<16x16xf32>
    %c0_172 = arith.constant 0 : index
    %c0_173 = arith.constant 0 : index
    %387 = vector.load %arg18[%c0_172, %c0_173] : memref<16x16xf32, #tpu.memory_space<vmem>>, vector<16x16xf32>
    %cst_174 = arith.constant dense<0.000000e+00> : vector<16x16xf32>
    %388 = tpu.matmul %386, %387, %cst_174 {dimension_numbers = #tpu.dot_dimension_numbers<[1], [0], [0], [1], [0, 0, 1, 1], [], []>} : vector<16x16xf32>, vector<16x16xf32>, vector<16x16xf32> -> vector<16x16xf32>
    %c0_175 = arith.constant 0 : index
    %c0_176 = arith.constant 0 : index
    %389 = vector.load %arg19[%c0_175, %c0_176] : memref<1x16xf32, #tpu.memory_space<vmem>>, vector<1x16xf32>
    %390 = vector.broadcast %389 : vector<1x16xf32> to vector<16x16xf32>
    %391 = arith.addf %388, %390 : vector<16x16xf32>
    %c0_177 = arith.constant 0 : index
    %c0_178 = arith.constant 0 : index
    %392 = vector.load %arg20[%c0_177, %c0_178] : memref<1x16xf32, #tpu.memory_space<vmem>>, vector<1x16xf32>
    %c0_179 = arith.constant 0 : index
    %c0_180 = arith.constant 0 : index
    %393 = vector.load %arg21[%c0_179, %c0_180] : memref<1x16xf32, #tpu.memory_space<vmem>>, vector<1x16xf32>
    %cst_181 = arith.constant dense<0.000000e+00> : vector<16xf32>
    %394 = vector.multi_reduction <add>, %391, %cst_181 [1] : vector<16x16xf32> to vector<16xf32>
    %395 = vector.shape_cast %394 : vector<16xf32> to vector<16x1xf32>
    %cst_182 = arith.constant 1.600000e+01 : f32
    %396 = vector.broadcast %cst_182 : f32 to vector<16x1xf32>
    %397 = arith.divf %395, %396 : vector<16x1xf32>
    %398 = vector.broadcast %397 : vector<16x1xf32> to vector<16x16xf32>
    %399 = arith.subf %391, %398 : vector<16x16xf32>
    %400 = arith.mulf %399, %399 : vector<16x16xf32>
    %cst_183 = arith.constant dense<0.000000e+00> : vector<16xf32>
    %401 = vector.multi_reduction <add>, %400, %cst_183 [1] : vector<16x16xf32> to vector<16xf32>
    %402 = vector.shape_cast %401 : vector<16xf32> to vector<16x1xf32>
    %cst_184 = arith.constant 1.600000e+01 : f32
    %403 = vector.broadcast %cst_184 : f32 to vector<16x1xf32>
    %404 = arith.divf %402, %403 : vector<16x1xf32>
    %405 = vector.broadcast %397 : vector<16x1xf32> to vector<16x16xf32>
    %406 = arith.subf %391, %405 : vector<16x16xf32>
    %cst_185 = arith.constant 9.99999974E-6 : f32
    %407 = vector.broadcast %cst_185 : f32 to vector<16x1xf32>
    %408 = arith.addf %404, %407 : vector<16x1xf32>
    %409 = math.rsqrt %408 : vector<16x1xf32>
    %410 = vector.broadcast %409 : vector<16x1xf32> to vector<16x16xf32>
    %411 = arith.mulf %406, %410 : vector<16x16xf32>
    %412 = vector.broadcast %392 : vector<1x16xf32> to vector<16x16xf32>
    %413 = arith.mulf %411, %412 : vector<16x16xf32>
    %414 = vector.broadcast %393 : vector<1x16xf32> to vector<16x16xf32>
    %415 = arith.addf %413, %414 : vector<16x16xf32>
    %c0_186 = arith.constant 0 : index
    %c0_187 = arith.constant 0 : index
    %416 = vector.load %arg22[%c0_186, %c0_187] : memref<16x16xf32, #tpu.memory_space<vmem>>, vector<16x16xf32>
    tpu.vector_store %arg22[%c0_186, %c0_187], %415 {strides = array<i32>} : memref<16x16xf32, #tpu.memory_space<vmem>>, vector<16x16xf32>,
    return
  }
}

</mosaic_0001>

<bundles_post_ra>
// kernel: eq.8
= control target key start
LH: loop header
LB: loop body
LE: loop exit
PB: predicated region body
PF: predicated region fallthrough
CT: control target
= control target key end

     0   :  { %vm7_vm0 = vcmask 64512   ;;  %vm13_vm1 = vcmask 130112   ;;  %s39_s0 = inlined_call_operand.vmem [shape: s32[2,8], index: 0, kind: input, shape index: {}]   ;;  %s40_s1 = inlined_call_operand.vmem [shape: s32[16], index: 1, kind: output, shape index: {}]  }
   0x1   :  { %v4_v0 = vld [vmem:[%s39_s0] sm:$0x3]  ;;  %s22_s0 = smov 8  }
   0x2   :  { %5 = vst [vmem:[#allocation1] sm:$0x3] %v4_v0 }
   0x9   :  { %v10_v1 = vld [vmem:[#allocation1 + $0x1] sm:$0x1]   ;;  %v6_v2 = vld [vmem:[#allocation1] sm:$0x1]  }
   0xa   :  { %11 = vrot.lane.b32.xlu0 %v10_v1, %s22_s0  ;;  %8 = vst.msk [vmem:[#allocation0] sm:$0x1] %vm7_vm0, %v6_v2  }
  0x7c   :  { %v12_v3 = vpop.permute.xlu0 %11  }
  0x7d   :  { %14 = vst.msk [vmem:[#allocation0] sm:$0x1] %vm13_vm1, %v12_v3  }
  0x84   :  { %v18_v4 = vld [vmem:[#allocation0] sm:$0x1] }
  0x85   :  { %20 = vst [vmem:[%s40_s1] sm:$0x1] %v18_v4 }

// kernel: roberta_encoder_forward.1
= control target key start
LH: loop header
LB: loop body
LE: loop exit
PB: predicated region body
PF: predicated region fallthrough
CT: control target
= control target key end

     0   :  { %s5011_s0 = inlined_call_operand.vmem [shape: f32[16,32], index: 0, kind: input, shape index: {}]   ;;  %s5012_s1 = inlined_call_operand.vmem [shape: f32[16,16], index: 1, kind: input, shape index: {}]   ;;  %s5013_s2 = inlined_call_operand.vmem [shape: f32[1,32], index: 2, kind: input, shape index: {}]   ;;  %s5014_s3 = inlined_call_operand.vmem [shape: f32[1,32], index: 3, kind: input, shape index: {}]   ;;  %s5015_s4 = inlined_call_operand.vmem [shape: f32[2,32,96], index: 4, kind: input, shape index: {}]   ;;  %s5016_s5 = inlined_call_operand.vmem [shape: f32[2,1,96], index: 5, kind: input, shape index: {}]   ;;  %s5017_s6 = inlined_call_operand.vmem [shape: f32[2,32,32], index: 6, kind: input, shape index: {}]   ;;  %s5018_s7 = inlined_call_operand.vmem [shape: f32[2,1,32], index: 7, kind: input, shape index: {}]   ;;  %s5019_s8 = inlined_call_operand.vmem [shape: f32[2,1,32], index: 8, kind: input, shape index: {}]   ;;  %s5020_s9 = inlined_call_operand.vmem [shape: f32[2,1,32], index: 9, kind: input, shape index: {}]   ;;  %s5021_s10 = inlined_call_operand.vmem [shape: f32[2,32,64], index: 10, kind: input, shape index: {}]   ;;  %s5022_s11 = inlined_call_operand.vmem [shape: f32[2,1,64], index: 11, kind: input, shape index: {}]   ;;  %s5023_s12 = inlined_call_operand.vmem [shape: f32[2,64,32], index: 12, kind: input, shape index: {}]   ;;  %s5024_s13 = inlined_call_operand.vmem [shape: f32[2,1,32], index: 13, kind: input, shape index: {}]   ;;  %s5025_s14 = inlined_call_operand.vmem [shape: f32[2,1,32], index: 14, kind: input, shape index: {}]   ;;  %s5026_s15 = inlined_call_operand.vmem [shape: f32[2,1,32], index: 15, kind: input, shape index: {}]   ;;  %s5027_s16 = inlined_call_operand.vmem [shape: f32[32,16], index: 16, kind: input, shape index: {}]   ;;  %s5028_s17 = inlined_call_operand.vmem [shape: f32[1,16], index: 17, kind: input, shape index: {}]   ;;  %s5029_s18 = inlined_call_operand.vmem [shape: f32[16,16], index: 18, kind: input, shape index: {}]   ;;  %s5030_s19 = inlined_call_operand.vmem [shape: f32[1,16], index: 19, kind: input, shape index: {}]   ;;  %s5031_s20 = inlined_call_operand.vmem [shape: f32[1,16], index: 20, kind: input, shape index: {}]   ;;  %s5032_s21 = inlined_call_operand.vmem [shape: f32[1,16], index: 21, kind: input, shape index: {}]   ;;  %s5033_s22 = inlined_call_operand.hbm [shape: f32[16,16], index: 22, kind: output, shape index: {}]  }
   0x1   :  { %5049 = sst [smem:[#allocation5_spill]] %s5011_s0 }
   0x2   :  { %5050 = sst [smem:[#allocation6_spill]] %s5012_s1 }
   0x3   :  { %5051 = sst [smem:[#allocation7_spill]] %s5013_s2 }
   0x4   :  { %5052 = sst [smem:[#allocation8_spill]] %s5014_s3 }
   0x5   :  { %5053 = sst [smem:[#allocation9_spill]] %s5015_s4 }
   0x6   :  { %5054 = sst [smem:[#allocation10_spill]] %s5016_s5 }
   0x7   :  { %5055 = sst [smem:[#allocation11_spill]] %s5017_s6 }
   0x8   :  { %s5056_s29 = sld [smem:[#allocation5_spill]]  ;;  %vm78_vm0 = vcmask 261120  }
   0xe   :  { %v72_v0 = vld [vmem:[%s5056_s29] sm:$0xff]  ;;  %v73_v1 = vld [vmem:[%s5056_s29 + $0x8] sm:$0xff] }
   0xf   :  { %27 = vsyncpa [#allocation3], 0  ;;  %v79_v2 = vsel %vm78_vm0, %v72_v0, 0.0  ;;  %v82_v3 = vsel %vm78_vm0, %v73_v1, 0.0  ;;  %s5057_s1 = sld [smem:[#allocation9_spill]]  ;;  %s5058_s28 = sld [smem:[#allocation7_spill]] }
  0x10   :  { %80 = vadd.xlane.f32.xlu0 %v79_v2  ;;  %s5059_s4 = sld [smem:[#allocation8_spill]]  ;;  %s5060_s5 = sld [smem:[#allocation10_spill]]  ;;  %vm224_vm1 = vcmask 64512   ;;  %vm312_vm3 = vcmask 130048   ;;  %vm1534_vm4 = vcmask 523264  }
  0x11   :  { %s4378_s24 = smov 88   ;;  %s4379_s6 = smov 96   ;;  %vm4572_vm2 = vmpackc.low %vm224_vm1, %vm224_vm1 }
  0x12   :  { %s4380_s25 = smov 120   ;;  %s5048_s26 = smov 80  }
  0x13   :  { %s5046_s2 = smov 112   ;;  %s5042_s0 = smov 72  }
  0x14   :  { %83 = vadd.xlane.f32.xlu0 %v82_v3  ;;  %s5040_s23 = smov 104   ;;  %s5039_s27 = smov 56  }
  0x15   :  { %v122_v14 = vld [vmem:[%s5057_s1] sm:$0xff]  ;;  %v123_v15 = vld [vmem:[%s5057_s1 + $0x8] sm:$0xff]  ;;  %v124_v16 = vld [vmem:[%s5057_s1 + $0x10] sm:$0xff]  ;;  %s5064_s30 = sld [smem:[#allocation11_spill]]  ;;  %s5043_s3 = smov 40  }
  0x16   :  { %v3990_v17 = vpack.c.bf16 %v123_v15, %v122_v14  ;;  %v125_v18 = vld [vmem:[%s5057_s1 + $0x18] sm:$0xff]  ;;  %v3466_v27 = vld [vmem:[%s5058_s28] ss:$0 sm:$0xff]  ;;  %s5063_s28 = sld [smem:[#allocation6_spill]] }
  0x17   :  { %v3994_v19 = vpack.c.bf16 %v125_v18, %v124_v16  ;;  %v3467_v29 = vld [vmem:[%s5059_s4] ss:$0 sm:$0xff]  ;;  %s5045_s4 = smov 64  }
  0x18   :  { %3991 = vmatprep.subr.bf16.mxu0 %v3990_v17  ;;  %v3468_v36 = vld [vmem:[%s5060_s5] ss:$0 sm:$0xff] }
  0x19   :  { %3993 = vmatpush3.bf16.msra.mxu0 %v3990_v17 }
  0x1a   :  { %3995 = vmatprep.subr.bf16.mxu0 %v3994_v19 }
  0x1c   :  { %v4597_v60 = vld [vmem:[%s5063_s28 + $0x8] sm:$0xff]  ;;  %v4602_v63 = vld [vmem:[%s5063_s28] sm:$0xff] }
  0x1d   :  { %3997 = vmatpush3.bf16.msra.mxu0 %v3994_v19 }
  0x9d   :  { %v81_v4 = vpop.xlane.xlu0 %80 }
  0x9e   :  { %v86_v5 = vmul.f32 0.03125, %v81_v4 }
  0xa0   :  { %v88_v6 = vsub.f32 %v72_v0, %v86_v5 }
  0xa1   :  { %v84_v7 = vpop.xlane.xlu0 %83 }
  0xa2   :  { %v87_v8 = vmul.f32 0.03125, %v84_v7  ;;  %v90_v9 = vmul.f32 %v88_v6, %v88_v6 }
  0xa4   :  { %v89_v10 = vsub.f32 %v73_v1, %v87_v8  ;;  %v92_v11 = vsel %vm78_vm0, %v90_v9, 0.0 }
  0xa5   :  { %93 = vadd.xlane.f32.xlu1 %v92_v11 }
  0xa6   :  { %v91_v12 = vmul.f32 %v89_v10, %v89_v10 }
  0xa8   :  { %v95_v13 = vsel %vm78_vm0, %v91_v12, 0.0 }
  0xa9   :  { %96 = vadd.xlane.f32.xlu1 %v95_v13 }
 0x132   :  { %v94_v20 = vpop.xlane.xlu1 %93 }
 0x133   :  { %v98_v21 = vmul.f32 0.03125, %v94_v20 }
 0x135   :  { %v100_v22 = vadd.f32 1e-05, %v98_v21 }
 0x136   :  { %v97_v23 = vpop.xlane.xlu1 %96 }
 0x137   :  { %4252 = vrsqrt.f32 %v100_v22  ;;  %v99_v24 = vmul.f32 0.03125, %v97_v23 }
 0x139   :  { %v101_v25 = vadd.f32 1e-05, %v99_v24 }
 0x13b   :  { %4254 = vrsqrt.f32 %v101_v25 }
 0x141   :  { %v4253_v26 = vpop.eup %4252 }
 0x142   :  { %v104_v28 = vmul.f32 %v4253_v26, %v88_v6 }
 0x144   :  { %v112_v30 = vmul.f32 %v3466_v27, %v104_v28 }
 0x145   :  { %v4255_v31 = vpop.eup %4254 }
 0x146   :  { %v105_v32 = vmul.f32 %v4255_v31, %v89_v10  ;;  %v4535_v33 = vadd.f32 %v3467_v29, %v112_v30 }
 0x148   :  { %v113_v34 = vmul.f32 %v3466_v27, %v105_v32  ;;  %3746 = vmatprep.mubr.msk.f32.mxu0 %vm78_vm0, %v4535_v33 }
 0x14a   :  { %v4539_v35 = vadd.f32 %v3467_v29, %v113_v34 }
 0x14c   :  { %3747 = vmatmul.mubr.msk.f32.vlgmr.msra.gmra.mrb[0].mxu0 %vm78_vm0, %v4539_v35 }
 0x21f   :  { %v3748_v37 = vpop.f32.mrb[0].mxu0 }
 0x220   :  { %v4546_v38 = vadd.f32 %v3748_v37, %v3468_v36  ;;  %v205_v39 = vpop.f32.mrb[1].mxu0 }
 0x221   :  { %v4548_v40 = vadd.f32 %v3468_v36, %v205_v39 }
 0x223   :  { %3753 = vmatprep.mubr.msk.f32.mxu1 %vm224_vm1, %v4548_v40  ;;  %v4554_v41 = vpack.i.bf16 %v4546_v38, %v4548_v40 }
 0x225   :  { %4178 = vrot.lane.b32.xlu1 %v4554_v41, %s4378_s24  ;;  %4173 = vrot.lane.b32.xlu0 %v4554_v41, %s4379_s6 }
 0x229   :  { %422 = vrot.lane.b32.xlu1 %v4548_v40, %s4380_s25  ;;  %4183 = vrot.lane.b32.xlu0 %v4554_v41, %s5048_s26  ;;  %s5071_s26 = smov 48  }
 0x22d   :  { %424 = vrot.lane.b32.xlu1 %v4546_v38, %s4380_s25  ;;  %790 = vrot.lane.b32.xlu0 %v4546_v38, %s5046_s2 }
 0x231   :  { %788 = vrot.lane.b32.xlu1 %v4548_v40, %s5046_s2 }
 0x297   :  { %v4179_v42 = vpop.permute.xlu1 %4178  ;;  %v4174_v43 = vpop.permute.xlu0 %4173 }
 0x298   :  { %v4181_v44 = vunpack.i.h.bf16 %v4179_v42  ;;  %v4180_v45 = vunpack.i.l.bf16 %v4179_v42  ;;  %v4176_v46 = vunpack.i.h.bf16 %v4174_v43  ;;  %v4175_v47 = vunpack.i.l.bf16 %v4174_v43 }
 0x29a   :  { %v3998_v49 = vpack.c.bf16 %v4176_v46, %v4175_v47  ;;  %v4008_v50 = vpack.c.bf16 %v4181_v44, %v4180_v45 }
 0x29b   :  { %v4184_v51 = vpop.permute.xlu0 %4183  ;;  %v423_v52 = vpop.permute.xlu1 %422 }
 0x29c   :  { %4000 = vmatprep.subr.msk.bf16.mxu1 %vm4572_vm2, %v3998_v49  ;;  %v4186_v53 = vunpack.i.h.bf16 %v4184_v51  ;;  %v4185_v54 = vunpack.i.l.bf16 %v4184_v51 }
 0x29d   :  { %4003 = vmatpush3.bf16.xpose.msk.msra.mxu1 %vm4572_vm2, %v3998_v49 }
 0x29e   :  { %4010 = vmatprep.subr.msk.bf16.mxu1 %vm4572_vm2, %v4008_v50  ;;  %v4018_v55 = vpack.c.bf16 %v4186_v53, %v4185_v54 }
 0x29f   :  { %v425_v56 = vpop.permute.xlu1 %424  ;;  %v791_v58 = vpop.permute.xlu0 %790 }
 0x2a3   :  { %v789_v57 = vpop.permute.xlu1 %788 }
 0x2a4   :  { %3754 = vmatmul.mubr.msk.f32.vlgmr.msra.gmra.mrb[0].mxu1 %vm224_vm1, %v4546_v38 }
 0x2a5   :  { %4013 = vmatpush3.bf16.xpose.msk.msra.mxu1 %vm4572_vm2, %v4008_v50  ;;  %3767 = vmatprep.mubr.msk.f32.mxu1 %vm224_vm1, %v423_v52 }
 0x2a6   :  { %4020 = vmatprep.subr.msk.bf16.mxu1 %vm4572_vm2, %v4018_v55 }
 0x2ac   :  { %3768 = vmatmul.mubr.msk.f32.vlgmr.msra.gmra.mrb[2].mxu1 %vm224_vm1, %v425_v56 }
 0x2ad   :  { %4023 = vmatpush3.bf16.xpose.msk.msra.mxu1 %vm4572_vm2, %v4018_v55  ;;  %3791 = vmatprep.mubr.msk.f32.mxu1 %vm224_vm1, %v789_v57 }
 0x2b4   :  { %3792 = vmatmul.mubr.msk.f32.vlgmr.msra.gmra.mrb[4].mxu1 %vm224_vm1, %v791_v58 }
 0x377   :  { %v3755_v59 = vpop.f32.mrb[0].mxu1 }
 0x378   :  { %v309_v61 = vmul.f32 0.35355338, %v3755_v59  ;;  %v299_v62 = vpop.f32.mrb[1].mxu1 }
 0x379   :  { %v308_v0 = vmul.f32 0.35355338, %v299_v62 }
 0x37a   :  { %v311_v1 = vadd.f32 %v309_v61, %v4597_v60 }
 0x37b   :  { %v310_v2 = vadd.f32 %v308_v0, %v4602_v63 }
 0x37c   :  { %v316_v3 = vsel %vm312_vm3, %v311_v1, -inf }
 0x37d   :  { %317 = vmax.xlane.f32.xlu0 %v316_v3  ;;  %v313_v4 = vsel %vm312_vm3, %v310_v2, -inf }
 0x37e   :  { %314 = vmax.xlane.f32.xlu1 %v313_v4 }
 0x37f   :  { %v3769_v5 = vpop.f32.mrb[2].mxu1 }
 0x380   :  { %v504_v6 = vpop.f32.mrb[3].mxu1  ;;  %v514_v7 = vmul.f32 0.35355338, %v3769_v5 }
 0x381   :  { %v513_v8 = vmul.f32 0.35355338, %v504_v6 }
 0x382   :  { %v516_v11 = vadd.f32 %v514_v7, %v4597_v60 }
 0x383   :  { %v515_v9 = vadd.f32 %v513_v8, %v4602_v63 }
 0x384   :  { %v520_v14 = vsel %vm312_vm3, %v516_v11, -inf }
 0x385   :  { %v517_v10 = vsel %vm312_vm3, %v515_v9, -inf }
 0x386   :  { %518 = vmax.xlane.f32.xlu0 %v517_v10 }
 0x387   :  { %v3793_v12 = vpop.f32.mrb[4].mxu1 }
 0x388   :  { %v870_v13 = vpop.f32.mrb[5].mxu1  ;;  %v880_v42 = vmul.f32 0.35355338, %v3793_v12 }
 0x389   :  { %v879_v37 = vmul.f32 0.35355338, %v870_v13 }
 0x38a   :  { %521 = vmax.xlane.f32.xlu0 %v520_v14  ;;  %v882_v44 = vadd.f32 %v880_v42, %v4597_v60 }
 0x38b   :  { %v881_v39 = vadd.f32 %v879_v37, %v4602_v63 }
 0x38c   :  { %v886_v45 = vsel %vm312_vm3, %v882_v44, -inf }
 0x38d   :  { %v883_v43 = vsel %vm312_vm3, %v881_v39, -inf }
 0x40a   :  { %v318_v15 = vpop.xlane.xlu0 %317 }
 0x40b   :  { %v320_v16 = vsub.f32 %v311_v1, %v318_v15  ;;  %v315_v17 = vpop.xlane.xlu1 %314 }
 0x40c   :  { %v319_v18 = vsub.f32 %v310_v2, %v315_v17 }
 0x40d   :  { %v323_v19 = vmul.f32 1.442695, %v320_v16 }
 0x40e   :  { %v321_v20 = vmul.f32 1.442695, %v319_v18 }
 0x40f   :  { %4256 = vpow2.f32 %v323_v19  ;;  %v215_v19 = vld [vmem:[%s5064_s30 + $0x8] sm:$0xff] }
 0x410   :  { %4258 = vpow2.f32 %v321_v20  ;;  %v214_v20 = vld [vmem:[%s5064_s30] sm:$0xff] }
 0x413   :  { %v519_v21 = vpop.xlane.xlu0 %518 }
 0x414   :  { %v523_v22 = vsub.f32 %v515_v9, %v519_v21 }
 0x416   :  { %v525_v23 = vmul.f32 1.442695, %v523_v22 }
 0x417   :  { %v522_v24 = vpop.xlane.xlu0 %521 }
 0x418   :  { %4260 = vpow2.f32 %v525_v23  ;;  %v524_v25 = vsub.f32 %v516_v11, %v522_v24 }
 0x419   :  { %v4257_v26 = vpop.eup %4256 }
 0x41a   :  { %v4259_v27 = vpop.eup %4258  ;;  %v527_v28 = vmul.f32 1.442695, %v524_v25  ;;  %v328_v29 = vsel %vm312_vm3, %v4257_v26, 0.0 }
 0x41b   :  { %329 = vadd.xlane.f32.xlu0 %v328_v29  ;;  %v325_v30 = vsel %vm312_vm3, %v4259_v27, 0.0 }
 0x41c   :  { %4262 = vpow2.f32 %v527_v28  ;;  %326 = vadd.xlane.f32.xlu1 %v325_v30 }
 0x422   :  { %v4261_v31 = vpop.eup %4260 }
 0x423   :  { %v529_v32 = vsel %vm312_vm3, %v4261_v31, 0.0 }
 0x424   :  { %530 = vadd.xlane.f32.xlu1 %v529_v32 }
 0x426   :  { %v4263_v34 = vpop.eup %4262 }
 0x427   :  { %v532_v36 = vsel %vm312_vm3, %v4263_v34, 0.0 }
 0x428   :  { %533 = vadd.xlane.f32.xlu0 %v532_v36 }
 0x435   :  { %4188 = vrot.lane.b32.xlu1 %v4554_v41, %s5045_s4 }
 0x439   :  { %4198 = vrot.lane.b32.xlu1 %v4554_v41, %s5042_s0  ;;  %s5044_s0 = smov 48  }
 0x43d   :  { %1075 = vrot.lane.b32.xlu1 %v4548_v40, %s5040_s23 }
 0x43e   :  { %4193 = vrot.lane.b32.xlu0 %v4554_v41, %s5039_s27  ;;  %s5070_s27 = smov 56  }
 0x441   :  { %1077 = vrot.lane.b32.xlu1 %v4546_v38, %s5040_s23 }
 0x45d   :  { %884 = vmax.xlane.f32.xlu0 %v883_v43 }
 0x465   :  { %887 = vmax.xlane.f32.xlu1 %v886_v45 }
 0x4a8   :  { %v330_v46 = vpop.xlane.xlu0 %329 }
 0x4a9   :  { %v327_v40 = vpop.xlane.xlu1 %326 }
 0x4aa   :  { %4264 = vrcp.f32 %v327_v40 }
 0x4ab   :  { %4266 = vrcp.f32 %v330_v46 }
 0x4b1   :  { %v531_v47 = vpop.xlane.xlu1 %530 }
 0x4b2   :  { %4268 = vrcp.f32 %v531_v47  ;;  %v216_v47 = vld [vmem:[%s5064_s30 + $0x10] sm:$0xff] }
 0x4b4   :  { %v4265_v49 = vpop.eup %4264 }
 0x4b5   :  { %v534_v38 = vpop.xlane.xlu0 %533  ;;  %v4189_v50 = vpop.permute.xlu1 %4188  ;;  %v333_v51 = vmul.f32 %v4265_v49, %v4259_v27 }
 0x4b6   :  { %4270 = vrcp.f32 %v534_v38  ;;  %v4191_v52 = vunpack.i.h.bf16 %v4189_v50  ;;  %v4190_v53 = vunpack.i.l.bf16 %v4189_v50  ;;  %v4267_v55 = vpop.eup %4266 }
 0x4b7   :  { %3760 = vmatprep.mubr.msk.f32.mxu0 %vm312_vm3, %v333_v51  ;;  %v334_v1 = vmul.f32 %v4267_v55, %v4257_v26 }
 0x4b8   :  { %v4004_v54 = vpack.c.bf16 %v4191_v52, %v4190_v53 }
 0x4b9   :  { %v4194_v56 = vpop.permute.xlu0 %4193  ;;  %v4199_v57 = vpop.permute.xlu1 %4198 }
 0x4ba   :  { %v4196_v58 = vunpack.i.h.bf16 %v4194_v56  ;;  %v4195_v59 = vunpack.i.l.bf16 %v4194_v56  ;;  %v4201_v61 = vunpack.i.h.bf16 %v4199_v57  ;;  %v4200_v62 = vunpack.i.l.bf16 %v4199_v57  ;;  %4005 = vmatprep.subr.bf16.mxu0 %v4004_v54 }
 0x4bb   :  { %4007 = vmatpush3.bf16.msra.mxu0 %v4004_v54 }
 0x4bc   :  { %v4269_v0 = vpop.eup %4268  ;;  %v4014_v2 = vpack.c.bf16 %v4196_v58, %v4195_v59  ;;  %v4028_v3 = vpack.c.bf16 %v4201_v61, %v4200_v62 }
 0x4bd   :  { %v1076_v4 = vpop.permute.xlu1 %1075  ;;  %v537_v5 = vmul.f32 %v4269_v0, %v4261_v31 }
 0x4be   :  { %3761 = vmatmul.mubr.msk.f32.vlgmr.msra.gmra.mrb[2].mxu0 %vm312_vm3, %v334_v1  ;;  %4015 = vmatprep.subr.bf16.mxu0 %v4014_v2 }
 0x4bf   :  { %4030 = vmatprep.subr.msk.bf16.mxu1 %vm4572_vm2, %v4028_v3  ;;  %3810 = vmatprep.mubr.msk.f32.mxu1 %vm224_vm1, %v1076_v4  ;;  %v217_v4 = vld [vmem:[%s5064_s30 + $0x18] sm:$0xff] }
 0x4c0   :  { %v4271_v6 = vpop.eup %4270  ;;  %4017 = vmatpush3.bf16.msra.mxu0 %v4014_v2  ;;  %3774 = vmatprep.mubr.msk.f32.mxu0 %vm312_vm3, %v537_v5 }
 0x4c1   :  { %v538_v7 = vmul.f32 %v4271_v6, %v4263_v34  ;;  %4033 = vmatpush3.bf16.xpose.msk.msra.mxu1 %vm4572_vm2, %v4028_v3  ;;  %v1078_v8 = vpop.permute.xlu1 %1077  ;;  %3777 = vmatprep.subr.mxu0 %v215_v19 }
 0x4c3   :  { %3775 = vmatmul.mubr.msk.f32.vlgmr.msra.gmra.mrb[4].mxu0 %vm312_vm3, %v538_v7 }
 0x4c4   :  { %3778 = vmatpush3.msra.mxu0 %v215_v19 }
 0x4c5   :  { %3782 = vmatprep.subr.mxu0 %v214_v20 }
 0x4c8   :  { %3811 = vmatmul.mubr.msk.f32.vlgmr.msra.gmra.mrb[6].mxu1 %vm224_vm1, %v1078_v8 }
 0x4ea   :  { %v885_v9 = vpop.xlane.xlu0 %884 }
 0x4eb   :  { %v889_v10 = vsub.f32 %v881_v39, %v885_v9 }
 0x4ed   :  { %v891_v13 = vmul.f32 1.442695, %v889_v10  ;;  %v3503_v10 = vld [vmem:[%s5018_s7] ss:$0 sm:$0xff] }
 0x4f2   :  { %v888_v11 = vpop.xlane.xlu1 %887 }
 0x4f3   :  { %v890_v12 = vsub.f32 %v882_v44, %v888_v11 }
 0x4f5   :  { %v893_v14 = vmul.f32 1.442695, %v890_v12 }
 0x4f7   :  { %4272 = vpow2.f32 %v893_v14 }
 0x4f8   :  { %4274 = vpow2.f32 %v891_v13 }
 0x501   :  { %v4273_v15 = vpop.eup %4272 }
 0x502   :  { %v898_v16 = vsel %vm312_vm3, %v4273_v15, 0.0  ;;  %v4275_v17 = vpop.eup %4274 }
 0x503   :  { %899 = vadd.xlane.f32.xlu0 %v898_v16  ;;  %v895_v18 = vsel %vm312_vm3, %v4275_v17, 0.0 }
 0x507   :  { %896 = vadd.xlane.f32.xlu0 %v895_v18 }
 0x51d   :  { %4203 = vrot.lane.b32.xlu0 %v4554_v41, %s5044_s0  ;;  %s5066_s0 = smov 112  }
 0x590   :  { %v900_v21 = vpop.xlane.xlu0 %899 }
 0x591   :  { %v3762_v22 = vpop.f32.mrb[2].mxu0 }
 0x592   :  { %v413_v23 = vpop.f32.mrb[3].mxu0 }
 0x594   :  { %v897_v24 = vpop.xlane.xlu0 %896 }
 0x595   :  { %4276 = vrcp.f32 %v897_v24 }
 0x596   :  { %4278 = vrcp.f32 %v900_v21  ;;  %v3776_v25 = vpop.f32.mrb[4].mxu0 }
 0x597   :  { %v617_v26 = vpop.f32.mrb[5].mxu0 }
 0x598   :  { %v4204_v27 = vpop.permute.xlu0 %4203  ;;  %3779 = vmatprep.mubr.msk.f32.mxu0 %vm224_vm1, %v617_v26 }
 0x599   :  { %v4206_v28 = vunpack.i.h.bf16 %v4204_v27  ;;  %v4205_v29 = vunpack.i.l.bf16 %v4204_v27  ;;  %3780 = vmatmul.mubr.msk.f32.vlgmr.msra.gmra.mrb[6].mxu0 %vm224_vm1, %v3776_v25 }
 0x59a   :  { %3784 = vmatprep.mubr.msk.f32.mxu0 %vm224_vm1, %v413_v23  ;;  %3783 = vmatpush3.msra.mxu0 %v214_v20 }
 0x59b   :  { %v4024_v30 = vpack.c.bf16 %v4206_v28, %v4205_v29  ;;  %v3812_v31 = vpop.f32.mrb[6].mxu1  ;;  %v1418_v28 = vld [vmem:[%s5021_s10 + $0x8] sm:$0xff] }
 0x59c   :  { %v1157_v32 = vpop.f32.mrb[7].mxu1  ;;  %v1167_v34 = vmul.f32 0.35355338, %v3812_v31  ;;  %v1420_v31 = vld [vmem:[%s5021_s10 + $0x18] sm:$0xff] }
 0x59d   :  { %v1166_v36 = vmul.f32 0.35355338, %v1157_v32  ;;  %4025 = vmatprep.subr.bf16.mxu0 %v4024_v30 }
 0x59e   :  { %v1169_v45 = vadd.f32 %v1167_v34, %v4597_v60 }
 0x59f   :  { %v4277_v37 = vpop.eup %4276  ;;  %v1168_v39 = vadd.f32 %v1166_v36, %v4602_v63 }
 0x5a0   :  { %v4279_v42 = vpop.eup %4278  ;;  %v903_v43 = vmul.f32 %v4277_v37, %v4275_v17  ;;  %v1173_v46 = vsel %vm312_vm3, %v1169_v45, -inf }
 0x5a1   :  { %v1170_v44 = vsel %vm312_vm3, %v1168_v39, -inf  ;;  %3785 = vmatmul.mubr.msk.f32.vlgmr.msra.gmra.mrb[6].mxu0 %vm224_vm1, %v3762_v22  ;;  %v904_v40 = vmul.f32 %v4279_v42, %v4273_v15 }
 0x5a2   :  { %1171 = vmax.xlane.f32.xlu1 %v1170_v44  ;;  %4027 = vmatpush3.bf16.msra.mxu0 %v4024_v30  ;;  %v1419_v30 = vld [vmem:[%s5021_s10 + $0x10] sm:$0xff] }
 0x5a3   :  { %3798 = vmatprep.mubr.msk.f32.mxu0 %vm312_vm3, %v903_v43  ;;  %3801 = vmatprep.subr.mxu0 %v216_v47  ;;  %v4042_v32 = vpack.c.bf16 %v1420_v31, %v1419_v30 }
 0x5a5   :  { %3799 = vmatmul.mubr.msk.f32.vlgmr.msra.gmra.mrb[8].mxu0 %vm312_vm3, %v904_v40 }
 0x5a6   :  { %1174 = vmax.xlane.f32.xlu1 %v1173_v46  ;;  %3802 = vmatpush3.msra.mxu0 %v216_v47  ;;  %v3505_v46 = vld [vmem:[%s5020_s9] ss:$0 sm:$0xff] }
 0x62f   :  { %v1172_v49 = vpop.xlane.xlu1 %1171 }
 0x630   :  { %v1176_v38 = vsub.f32 %v1168_v39, %v1172_v49 }
 0x632   :  { %v1178_v52 = vmul.f32 1.442695, %v1176_v38 }
 0x633   :  { %v1175_v50 = vpop.xlane.xlu1 %1174 }
 0x634   :  { %v1177_v51 = vsub.f32 %v1169_v45, %v1175_v50  ;;  %v3504_v45 = vld [vmem:[%s5019_s8] ss:$0 sm:$0xff] }
 0x636   :  { %v1180_v53 = vmul.f32 1.442695, %v1177_v51 }
 0x638   :  { %4280 = vpow2.f32 %v1180_v53  ;;  %v1519_v53 = vld [vmem:[%s5023_s12] sm:$0xff] }
 0x639   :  { %4282 = vpow2.f32 %v1178_v52 }
 0x642   :  { %v4281_v54 = vpop.eup %4280 }
 0x643   :  { %v1185_v55 = vsel %vm312_vm3, %v4281_v54, 0.0  ;;  %v4283_v56 = vpop.eup %4282 }
 0x644   :  { %1186 = vadd.xlane.f32.xlu1 %v1185_v55  ;;  %v1182_v57 = vsel %vm312_vm3, %v4283_v56, 0.0 }
 0x648   :  { %1183 = vadd.xlane.f32.xlu1 %v1182_v57  ;;  %v1522_v57 = vld [vmem:[%s5023_s12 + $0x18] sm:$0xff] }
 0x659   :  { %4208 = vrot.lane.b32.xlu1 %v4554_v41, %s5043_s3 }
 0x678   :  { %v3800_v58 = vpop.f32.mrb[8].mxu0 }
 0x679   :  { %v983_v59 = vpop.f32.mrb[9].mxu0 }
 0x67a   :  { %3803 = vmatprep.mubr.msk.f32.mxu0 %vm224_vm1, %v983_v59  ;;  %v1523_v59 = vld [vmem:[%s5023_s12 + $0x20] sm:$0xff] }
 0x67b   :  { %3804 = vmatmul.mubr.msk.f32.vlgmr.msra.gmra.mrb[6].mxu0 %vm224_vm1, %v3800_v58 }
 0x6d1   :  { %v1187_v61 = vpop.xlane.xlu1 %1186 }
 0x6d2   :  { %4284 = vrcp.f32 %v1187_v61  ;;  %v1524_v61 = vld [vmem:[%s5023_s12 + $0x28] sm:$0xff] }
 0x6d5   :  { %v1184_v62 = vpop.xlane.xlu1 %1183 }
 0x6d6   :  { %4286 = vrcp.f32 %v1184_v62  ;;  %v4054_v62 = vpack.c.bf16 %v1524_v61, %v1523_v59  ;;  %v3519_v61 = vld [vmem:[%s5060_s5 + $0x1] ss:$0 sm:$0xff]  ;;  %s5065_s5 = smov 80  }
 0x6d9   :  { %v4209_v0 = vpop.permute.xlu1 %4208 }
 0x6da   :  { %v4211_v1 = vunpack.i.h.bf16 %v4209_v0  ;;  %v4210_v2 = vunpack.i.l.bf16 %v4209_v0  ;;  %v1525_v0 = vld [vmem:[%s5023_s12 + $0x30] sm:$0xff] }
 0x6dc   :  { %v4034_v3 = vpack.c.bf16 %v4211_v1, %v4210_v2  ;;  %v4285_v41 = vpop.eup %4284  ;;  %v1526_v1 = vld [vmem:[%s5023_s12 + $0x38] sm:$0xff] }
 0x6dd   :  { %v1191_v7 = vmul.f32 %v4285_v41, %v4281_v54  ;;  %v1520_v54 = vld [vmem:[%s5023_s12 + $0x8] sm:$0xff]  ;;  %v4058_v2 = vpack.c.bf16 %v1526_v1, %v1525_v0 }
 0x6de   :  { %4035 = vmatprep.subr.bf16.mxu0 %v4034_v3  ;;  %v4046_v55 = vpack.c.bf16 %v1520_v54, %v1519_v53  ;;  %v3513_v53 = vld [vmem:[%s5026_s15] ss:$0 sm:$0xff] }
 0x6df   :  { %4037 = vmatpush3.bf16.msra.mxu0 %v4034_v3  ;;  %v3506_v3 = vld [vmem:[%s5022_s11] ss:$0 sm:$0xff] }
 0x6e0   :  { %v4287_v5 = vpop.eup %4286  ;;  %3820 = vmatprep.subr.mxu0 %v217_v4 }
 0x6e1   :  { %v1190_v6 = vmul.f32 %v4287_v5, %v4283_v56  ;;  %v1521_v56 = vld [vmem:[%s5023_s12 + $0x10] sm:$0xff] }
 0x6e2   :  { %v4050_v58 = vpack.c.bf16 %v1522_v57, %v1521_v56 }
 0x6e3   :  { %3817 = vmatprep.mubr.msk.f32.mxu0 %vm312_vm3, %v1190_v6 }
 0x6e4   :  { %3818 = vmatmul.mubr.msk.f32.vlgmr.msra.gmra.mrb[10].mxu0 %vm312_vm3, %v1191_v7 }
 0x6e5   :  { %3821 = vmatpush3.msra.mxu0 %v217_v4 }
 0x6e6   :  { %4047 = vmatprep.subr.bf16.mxu0 %v4046_v55 }
 0x7b7   :  { %v3819_v8 = vpop.f32.mrb[10].mxu0 }
 0x7b8   :  { %v1270_v9 = vpop.f32.mrb[11].mxu0 }
 0x7b9   :  { %3822 = vmatprep.mubr.msk.f32.mxu0 %vm224_vm1, %v1270_v9 }
 0x7ba   :  { %3823 = vmatmul.mubr.msk.f32.vlgmr.msra.gmra.mrb[6].mxu0 %vm224_vm1, %v3819_v8 }
 0x7bb   :  { %4049 = vmatpush3.bf16.msra.mxu0 %v4046_v55 }
 0x7bc   :  { %4051 = vmatprep.subr.bf16.mxu0 %v4050_v58 }
 0x7bf   :  { %4053 = vmatpush3.bf16.msra.mxu0 %v4050_v58 }
 0x7c0   :  { %4055 = vmatprep.subr.bf16.mxu0 %v4054_v62 }
 0x7c3   :  { %4057 = vmatpush3.bf16.msra.mxu0 %v4054_v62 }
 0x7c4   :  { %4059 = vmatprep.subr.bf16.mxu0 %v4058_v2 }
 0x7c7   :  { %4061 = vmatpush3.bf16.msra.mxu0 %v4058_v2 }
 0x88d   :  { %v3824_v11 = vpop.f32.mrb[6].mxu0 }
 0x88e   :  { %v1370_v12 = vadd.f32 %v3824_v11, %v3503_v10  ;;  %v1351_v13 = vpop.f32.mrb[7].mxu0 }
 0x88f   :  { %v1369_v14 = vadd.f32 %v3503_v10, %v1351_v13 }
 0x890   :  { %v1372_v15 = vadd.f32 %v1370_v12, %v4539_v35 }
 0x891   :  { %v1371_v16 = vadd.f32 %v1369_v14, %v4535_v33  ;;  %v1417_v33 = vld [vmem:[%s5021_s10] sm:$0xff] }
 0x892   :  { %v1378_v17 = vsel %vm78_vm0, %v1372_v15, 0.0  ;;  %v4038_v29 = vpack.c.bf16 %v1418_v28, %v1417_v33 }
 0x893   :  { %1379 = vadd.xlane.f32.xlu1 %v1378_v17  ;;  %v1375_v18 = vsel %vm78_vm0, %v1371_v16, 0.0  ;;  %v3509_v17 = vld [vmem:[%s5024_s13] ss:$0 sm:$0xff] }
 0x894   :  { %1376 = vadd.xlane.f32.xlu0 %v1375_v18  ;;  %4039 = vmatprep.subr.bf16.mxu1 %v4038_v29 }
 0x895   :  { %4041 = vmatpush3.bf16.msra.mxu1 %v4038_v29 }
 0x896   :  { %4043 = vmatprep.subr.bf16.mxu1 %v4042_v32 }
 0x899   :  { %4045 = vmatpush3.bf16.msra.mxu1 %v4042_v32 }
 0x920   :  { %v1380_v19 = vpop.xlane.xlu1 %1379 }
 0x921   :  { %v1382_v20 = vmul.f32 0.03125, %v1380_v19  ;;  %v1377_v21 = vpop.xlane.xlu0 %1376 }
 0x922   :  { %v1381_v22 = vmul.f32 0.03125, %v1377_v21 }
 0x923   :  { %v1384_v23 = vsub.f32 %v1372_v15, %v1382_v20 }
 0x924   :  { %v1383_v24 = vsub.f32 %v1371_v16, %v1381_v22 }
 0x925   :  { %v1386_v27 = vmul.f32 %v1384_v23, %v1384_v23 }
 0x926   :  { %v1385_v25 = vmul.f32 %v1383_v24, %v1383_v24 }
 0x927   :  { %v1390_v35 = vsel %vm78_vm0, %v1386_v27, 0.0 }
 0x928   :  { %v1387_v26 = vsel %vm78_vm0, %v1385_v25, 0.0 }
 0x929   :  { %1388 = vadd.xlane.f32.xlu0 %v1387_v26 }
 0x92d   :  { %1391 = vadd.xlane.f32.xlu0 %v1390_v35 }
 0x9b6   :  { %v1389_v34 = vpop.xlane.xlu0 %1388 }
 0x9b7   :  { %v1393_v36 = vmul.f32 0.03125, %v1389_v34 }
 0x9b9   :  { %v1395_v37 = vadd.f32 1e-05, %v1393_v36  ;;  %v3514_v36 = vld [vmem:[%s5057_s1 + $0x20] sm:$0xff] }
 0x9ba   :  { %v1392_v39 = vpop.xlane.xlu0 %1391 }
 0x9bb   :  { %4288 = vrsqrt.f32 %v1395_v37  ;;  %v1394_v42 = vmul.f32 0.03125, %v1392_v39  ;;  %v3515_v37 = vld [vmem:[%s5057_s1 + $0x28] sm:$0xff] }
 0x9bc   :  { %v4062_v39 = vpack.c.bf16 %v3515_v37, %v3514_v36 }
 0x9bd   :  { %v1396_v43 = vadd.f32 1e-05, %v1394_v42  ;;  %v3516_v42 = vld [vmem:[%s5057_s1 + $0x30] sm:$0xff] }
 0x9be   :  { %4063 = vmatprep.subr.bf16.mxu1 %v4062_v39 }
 0x9bf   :  { %4290 = vrsqrt.f32 %v1396_v43  ;;  %v3517_v43 = vld [vmem:[%s5057_s1 + $0x38] sm:$0xff] }
 0x9c5   :  { %v4289_v44 = vpop.eup %4288 }
 0x9c6   :  { %v1399_v40 = vmul.f32 %v4289_v44, %v1383_v24  ;;  %v4066_v44 = vpack.c.bf16 %v3517_v43, %v3516_v42 }
 0x9c8   :  { %v1407_v47 = vmul.f32 %v3504_v45, %v1399_v40 }
 0x9c9   :  { %v4291_v49 = vpop.eup %4290 }
 0x9ca   :  { %v1400_v38 = vmul.f32 %v4291_v49, %v1384_v23  ;;  %v1415_v50 = vadd.f32 %v3505_v46, %v1407_v47 }
 0x9cc   :  { %v1408_v51 = vmul.f32 %v3504_v45, %v1400_v38  ;;  %3833 = vmatprep.mubr.msk.f32.mxu1 %vm78_vm0, %v1415_v50 }
 0x9ce   :  { %v1416_v52 = vadd.f32 %v3505_v46, %v1408_v51  ;;  %v3512_v51 = vld [vmem:[%s5025_s14] ss:$0 sm:$0xff] }
 0x9d0   :  { %3834 = vmatmul.mubr.msk.f32.vlgmr.msra.gmra.mrb[8].mxu1 %vm78_vm0, %v1416_v52 }
 0x9d1   :  { %4065 = vmatpush3.bf16.msra.mxu1 %v4062_v39 }
 0x9d2   :  { %4067 = vmatprep.subr.bf16.mxu1 %v4066_v44 }
 0x9d5   :  { %4069 = vmatpush3.bf16.msra.mxu1 %v4066_v44 }
 0xaa3   :  { %v3835_v4 = vpop.f32.mrb[8].mxu1 }
 0xaa4   :  { %v1506_v41 = vadd.f32 %v3835_v4, %v3506_v3  ;;  %v1500_v5 = vpop.f32.mrb[9].mxu1 }
 0xaa5   :  { %v1501_v6 = vadd.f32 %v3506_v3, %v1500_v5 }
 0xaa6   :  { %v1512_v7 = vmul.f32 0.70710677, %v1506_v41  ;;  %v1510_v14 = vmul.f32 0.5, %v1506_v41 }
 0xaa7   :  { %v1511_v8 = vmul.f32 0.70710677, %v1501_v6  ;;  %v1509_v12 = vmul.f32 0.5, %v1501_v6 }
 0xaa8   :  { %4292 = verf.f32 %v1512_v7 }
 0xaa9   :  { %4294 = verf.f32 %v1511_v8 }
 0xab2   :  { %v4293_v9 = vpop.eup %4292 }
 0xab3   :  { %v4295_v10 = vpop.eup %4294  ;;  %v1516_v11 = vadd.f32 1.0, %v4293_v9 }
 0xab4   :  { %v1515_v13 = vadd.f32 1.0, %v4295_v10 }
 0xab5   :  { %v1518_v16 = vmul.f32 %v1516_v11, %v1510_v14 }
 0xab6   :  { %v1517_v15 = vmul.f32 %v1515_v13, %v1509_v12 }
 0xab8   :  { %3852 = vmatprep.mubr.msk.f32.mxu0 %vm1534_vm4, %v1517_v15 }
 0xab9   :  { %3853 = vmatmul.mubr.msk.f32.vlgmr.msra.gmra.mrb[12].mxu0 %vm1534_vm4, %v1518_v16 }
 0xb8c   :  { %v3854_v18 = vpop.f32.mrb[12].mxu0 }
 0xb8d   :  { %v1607_v19 = vpop.f32.mrb[13].mxu0  ;;  %v1613_v20 = vadd.f32 %v3854_v18, %v3509_v17 }
 0xb8e   :  { %v1608_v21 = vadd.f32 %v3509_v17, %v1607_v19 }
 0xb8f   :  { %v1617_v24 = vadd.f32 %v1613_v20, %v1416_v52 }
 0xb90   :  { %v1616_v22 = vadd.f32 %v1608_v21, %v1415_v50 }
 0xb91   :  { %v1623_v25 = vsel %vm78_vm0, %v1617_v24, 0.0 }
 0xb92   :  { %v1620_v23 = vsel %vm78_vm0, %v1616_v22, 0.0 }
 0xb93   :  { %1621 = vadd.xlane.f32.xlu0 %v1620_v23 }
 0xb97   :  { %1624 = vadd.xlane.f32.xlu0 %v1623_v25 }
 0xc20   :  { %v1622_v26 = vpop.xlane.xlu0 %1621 }
 0xc21   :  { %v1626_v27 = vmul.f32 0.03125, %v1622_v26 }
 0xc23   :  { %v1628_v35 = vsub.f32 %v1616_v22, %v1626_v27 }
 0xc24   :  { %v1625_v33 = vpop.xlane.xlu0 %1624 }
 0xc25   :  { %v1627_v28 = vmul.f32 0.03125, %v1625_v33  ;;  %v1630_v29 = vmul.f32 %v1628_v35, %v1628_v35 }
 0xc27   :  { %v1629_v30 = vsub.f32 %v1617_v24, %v1627_v28  ;;  %v1632_v31 = vsel %vm78_vm0, %v1630_v29, 0.0 }
 0xc28   :  { %1633 = vadd.xlane.f32.xlu0 %v1632_v31 }
 0xc29   :  { %v1631_v32 = vmul.f32 %v1629_v30, %v1629_v30 }
 0xc2b   :  { %v1635_v34 = vsel %vm78_vm0, %v1631_v32, 0.0 }
 0xc2c   :  { %1636 = vadd.xlane.f32.xlu1 %v1635_v34 }
 0xcb5   :  { %v1634_v45 = vpop.xlane.xlu0 %1633 }
 0xcb6   :  { %v1638_v40 = vmul.f32 0.03125, %v1634_v45 }
 0xcb8   :  { %v1640_v46 = vadd.f32 1e-05, %v1638_v40 }
 0xcb9   :  { %v1637_v47 = vpop.xlane.xlu1 %1636 }
 0xcba   :  { %4296 = vrsqrt.f32 %v1640_v46  ;;  %v1639_v49 = vmul.f32 0.03125, %v1637_v47 }
 0xcbc   :  { %v1641_v38 = vadd.f32 1e-05, %v1639_v49 }
 0xcbe   :  { %4298 = vrsqrt.f32 %v1641_v38 }
 0xcc4   :  { %v4297_v50 = vpop.eup %4296 }
 0xcc5   :  { %v1644_v52 = vmul.f32 %v4297_v50, %v1628_v35 }
 0xcc7   :  { %v1652_v54 = vmul.f32 %v3512_v51, %v1644_v52 }
 0xcc8   :  { %v4299_v55 = vpop.eup %4298 }
 0xcc9   :  { %v1645_v56 = vmul.f32 %v4299_v55, %v1629_v30  ;;  %v4759_v57 = vadd.f32 %v3513_v53, %v1652_v54 }
 0xccb   :  { %v1653_v58 = vmul.f32 %v3512_v51, %v1645_v56  ;;  %3863 = vmatprep.mubr.msk.f32.mxu1 %vm78_vm0, %v4759_v57 }
 0xccd   :  { %v4763_v59 = vadd.f32 %v3513_v53, %v1653_v58 }
 0xccf   :  { %3864 = vmatmul.mubr.msk.f32.vlgmr.msra.gmra.mrb[10].mxu1 %vm78_vm0, %v4763_v59 }
 0xda2   :  { %v3865_v62 = vpop.f32.mrb[10].mxu1 }
 0xda3   :  { %v4770_v0 = vadd.f32 %v3865_v62, %v3519_v61  ;;  %v1747_v1 = vpop.f32.mrb[11].mxu1 }
 0xda4   :  { %v4772_v2 = vadd.f32 %v3519_v61, %v1747_v1 }
 0xda6   :  { %3870 = vmatprep.mubr.msk.f32.mxu1 %vm224_vm1, %v4772_v2  ;;  %v4778_v3 = vpack.i.bf16 %v4770_v0, %v4772_v2 }
 0xda8   :  { %4218 = vrot.lane.b32.xlu1 %v4778_v3, %s4378_s24  ;;  %4213 = vrot.lane.b32.xlu0 %v4778_v3, %s4379_s6  ;;  %s5067_s24 = smov 64   ;;  %s5068_s6 = smov 72  }
 0xdac   :  { %1963 = vrot.lane.b32.xlu1 %v4772_v2, %s4380_s25  ;;  %4223 = vrot.lane.b32.xlu0 %v4778_v3, %s5065_s5 }
 0xdb0   :  { %1965 = vrot.lane.b32.xlu1 %v4770_v0, %s4380_s25  ;;  %2331 = vrot.lane.b32.xlu0 %v4770_v0, %s5066_s0  ;;  %s5069_s25 = smov 104  }
 0xdb4   :  { %2329 = vrot.lane.b32.xlu1 %v4772_v2, %s5066_s0 }
 0xe1a   :  { %v4219_v4 = vpop.permute.xlu1 %4218  ;;  %v4214_v41 = vpop.permute.xlu0 %4213 }
 0xe1b   :  { %v4221_v5 = vunpack.i.h.bf16 %v4219_v4  ;;  %v4220_v6 = vunpack.i.l.bf16 %v4219_v4  ;;  %v4216_v7 = vunpack.i.h.bf16 %v4214_v41  ;;  %v4215_v8 = vunpack.i.l.bf16 %v4214_v41 }
 0xe1d   :  { %v4070_v9 = vpack.c.bf16 %v4216_v7, %v4215_v8  ;;  %v4080_v10 = vpack.c.bf16 %v4221_v5, %v4220_v6 }
 0xe1e   :  { %v4224_v11 = vpop.permute.xlu0 %4223  ;;  %v1964_v12 = vpop.permute.xlu1 %1963 }
 0xe1f   :  { %4072 = vmatprep.subr.msk.bf16.mxu1 %vm4572_vm2, %v4070_v9  ;;  %v4226_v13 = vunpack.i.h.bf16 %v4224_v11  ;;  %v4225_v14 = vunpack.i.l.bf16 %v4224_v11 }
 0xe20   :  { %4075 = vmatpush3.bf16.xpose.msk.msra.mxu1 %vm4572_vm2, %v4070_v9 }
 0xe21   :  { %4082 = vmatprep.subr.msk.bf16.mxu1 %vm4572_vm2, %v4080_v10  ;;  %v4090_v15 = vpack.c.bf16 %v4226_v13, %v4225_v14 }
 0xe22   :  { %v1966_v16 = vpop.permute.xlu1 %1965  ;;  %v2332_v18 = vpop.permute.xlu0 %2331 }
 0xe26   :  { %v2330_v17 = vpop.permute.xlu1 %2329 }
 0xe27   :  { %3871 = vmatmul.mubr.msk.f32.vlgmr.msra.gmra.mrb[12].mxu1 %vm224_vm1, %v4770_v0 }
 0xe28   :  { %4085 = vmatpush3.bf16.xpose.msk.msra.mxu1 %vm4572_vm2, %v4080_v10  ;;  %3884 = vmatprep.mubr.msk.f32.mxu1 %vm224_vm1, %v1964_v12 }
 0xe29   :  { %4092 = vmatprep.subr.msk.bf16.mxu1 %vm4572_vm2, %v4090_v15 }
 0xe2f   :  { %3885 = vmatmul.mubr.msk.f32.vlgmr.msra.gmra.mrb[14].mxu1 %vm224_vm1, %v1966_v16 }
 0xe30   :  { %4095 = vmatpush3.bf16.xpose.msk.msra.mxu1 %vm4572_vm2, %v4090_v15  ;;  %3908 = vmatprep.mubr.msk.f32.mxu1 %vm224_vm1, %v2330_v17 }
 0xe37   :  { %3909 = vmatmul.mubr.msk.f32.vlgmr.msra.gmra.mrb[16].mxu1 %vm224_vm1, %v2332_v18 }
 0xefa   :  { %v3872_v19 = vpop.f32.mrb[12].mxu1 }
 0xefb   :  { %v1851_v20 = vmul.f32 0.35355338, %v3872_v19  ;;  %v1841_v21 = vpop.f32.mrb[13].mxu1 }
 0xefc   :  { %v1850_v22 = vmul.f32 0.35355338, %v1841_v21 }
 0xefd   :  { %v1853_v23 = vadd.f32 %v1851_v20, %v4597_v60 }
 0xefe   :  { %v1852_v24 = vadd.f32 %v1850_v22, %v4602_v63 }
 0xeff   :  { %v1857_v25 = vsel %vm312_vm3, %v1853_v23, -inf }
 0xf00   :  { %1858 = vmax.xlane.f32.xlu0 %v1857_v25  ;;  %v1854_v26 = vsel %vm312_vm3, %v1852_v24, -inf }
 0xf01   :  { %1855 = vmax.xlane.f32.xlu1 %v1854_v26 }
 0xf02   :  { %v3886_v27 = vpop.f32.mrb[14].mxu1 }
 0xf03   :  { %v2045_v35 = vpop.f32.mrb[15].mxu1  ;;  %v2055_v33 = vmul.f32 0.35355338, %v3886_v27 }
 0xf04   :  { %v2054_v28 = vmul.f32 0.35355338, %v2045_v35 }
 0xf05   :  { %v2057_v31 = vadd.f32 %v2055_v33, %v4597_v60 }
 0xf06   :  { %v2056_v29 = vadd.f32 %v2054_v28, %v4602_v63 }
 0xf07   :  { %v2061_v36 = vsel %vm312_vm3, %v2057_v31, -inf }
 0xf08   :  { %v2058_v30 = vsel %vm312_vm3, %v2056_v29, -inf }
 0xf09   :  { %2059 = vmax.xlane.f32.xlu0 %v2058_v30 }
 0xf0a   :  { %v3910_v32 = vpop.f32.mrb[16].mxu1 }
 0xf0b   :  { %v2411_v34 = vpop.f32.mrb[17].mxu1  ;;  %v2421_v4 = vmul.f32 0.35355338, %v3910_v32 }
 0xf0c   :  { %v2420_v62 = vmul.f32 0.35355338, %v2411_v34 }
 0xf0d   :  { %2062 = vmax.xlane.f32.xlu0 %v2061_v36  ;;  %v2423_v5 = vadd.f32 %v2421_v4, %v4597_v60 }
 0xf0e   :  { %v2422_v1 = vadd.f32 %v2420_v62, %v4602_v63 }
 0xf0f   :  { %v2427_v6 = vsel %vm312_vm3, %v2423_v5, -inf }
 0xf10   :  { %v2424_v41 = vsel %vm312_vm3, %v2422_v1, -inf }
 0xf8d   :  { %v1859_v37 = vpop.xlane.xlu0 %1858 }
 0xf8e   :  { %v1861_v39 = vsub.f32 %v1853_v23, %v1859_v37  ;;  %v1856_v42 = vpop.xlane.xlu1 %1855 }
 0xf8f   :  { %v1860_v43 = vsub.f32 %v1852_v24, %v1856_v42  ;;  %v3522_v42 = vld [vmem:[%s5064_s30 + $0x20] sm:$0xff] }
 0xf90   :  { %v1864_v44 = vmul.f32 1.442695, %v1861_v39  ;;  %v3523_v39 = vld [vmem:[%s5064_s30 + $0x28] sm:$0xff] }
 0xf91   :  { %v1862_v45 = vmul.f32 1.442695, %v1860_v43 }
 0xf92   :  { %4300 = vpow2.f32 %v1864_v44 }
 0xf93   :  { %4302 = vpow2.f32 %v1862_v45 }
 0xf96   :  { %v2060_v40 = vpop.xlane.xlu0 %2059 }
 0xf97   :  { %v2064_v46 = vsub.f32 %v2056_v29, %v2060_v40 }
 0xf99   :  { %v2066_v47 = vmul.f32 1.442695, %v2064_v46 }
 0xf9a   :  { %v2063_v49 = vpop.xlane.xlu0 %2062 }
 0xf9b   :  { %4304 = vpow2.f32 %v2066_v47  ;;  %v2065_v38 = vsub.f32 %v2057_v31, %v2063_v49 }
 0xf9c   :  { %v4301_v50 = vpop.eup %4300 }
 0xf9d   :  { %v4303_v51 = vpop.eup %4302  ;;  %v2068_v52 = vmul.f32 1.442695, %v2065_v38  ;;  %v1869_v53 = vsel %vm312_vm3, %v4301_v50, 0.0 }
 0xf9e   :  { %1870 = vadd.xlane.f32.xlu0 %v1869_v53  ;;  %v1866_v54 = vsel %vm312_vm3, %v4303_v51, 0.0 }
 0xf9f   :  { %4306 = vpow2.f32 %v2068_v52  ;;  %1867 = vadd.xlane.f32.xlu1 %v1866_v54 }
 0xfa5   :  { %v4305_v55 = vpop.eup %4304 }
 0xfa6   :  { %v2070_v56 = vsel %vm312_vm3, %v4305_v55, 0.0 }
 0xfa7   :  { %2071 = vadd.xlane.f32.xlu1 %v2070_v56 }
 0xfa9   :  { %v4307_v58 = vpop.eup %4306 }
 0xfaa   :  { %v2073_v61 = vsel %vm312_vm3, %v4307_v58, 0.0 }
 0xfab   :  { %2074 = vadd.xlane.f32.xlu0 %v2073_v61 }
 0xfb8   :  { %4228 = vrot.lane.b32.xlu1 %v4778_v3, %s5067_s24  ;;  %s4389_s24 = smov [#allocation2]  }
 0xfbc   :  { %4238 = vrot.lane.b32.xlu1 %v4778_v3, %s5068_s6  ;;  %s3455_s6 = sshll.u32 %s4389_s24, 4  ;;  %s3456_s6 = int_to_ptr.vmem [resolvable:$true] %s3455_s6 }
 0xfbd   :  { %p4359_p1 = scmp.lt.s32.totalorder %s3456_s6, %s3456_s6 }
 0xfc0   :  { %2616 = vrot.lane.b32.xlu1 %v4772_v2, %s5069_s25 }
 0xfc1   :  { %4233 = vrot.lane.b32.xlu0 %v4778_v3, %s5070_s27 }
 0xfc4   :  { %2618 = vrot.lane.b32.xlu1 %v4770_v0, %s5069_s25 }
 0xfe0   :  { %2425 = vmax.xlane.f32.xlu0 %v2424_v41  ;;  %v4353_v41 = vld [vmem:[%s5063_s28 + $0x8] sm:$0xff] }
 0xfe8   :  { %2428 = vmax.xlane.f32.xlu1 %v2427_v6 }
0x102b   :  { %v1871_v2 = vpop.xlane.xlu0 %1870 }
0x102c   :  { %v1868_v7 = vpop.xlane.xlu1 %1867 }
0x102d   :  { %4308 = vrcp.f32 %v1868_v7 }
0x102e   :  { %4310 = vrcp.f32 %v1871_v2  ;;  %v3524_v2 = vld [vmem:[%s5064_s30 + $0x30] sm:$0xff] }
0x1034   :  { %v2072_v8 = vpop.xlane.xlu1 %2071 }
0x1035   :  { %4312 = vrcp.f32 %v2072_v8 }
0x1037   :  { %v4309_v9 = vpop.eup %4308 }
0x1038   :  { %v2075_v0 = vpop.xlane.xlu0 %2074  ;;  %v4229_v10 = vpop.permute.xlu1 %4228  ;;  %v1874_v11 = vmul.f32 %v4309_v9, %v4303_v51 }
0x1039   :  { %4314 = vrcp.f32 %v2075_v0  ;;  %v4231_v63 = vunpack.i.h.bf16 %v4229_v10  ;;  %v4230_v12 = vunpack.i.l.bf16 %v4229_v10  ;;  %v4311_v60 = vpop.eup %4310 }
0x103a   :  { %3877 = vmatprep.mubr.msk.f32.mxu0 %vm312_vm3, %v1874_v11  ;;  %v1875_v21 = vmul.f32 %v4311_v60, %v4301_v50 }
0x103b   :  { %v4076_v13 = vpack.c.bf16 %v4231_v63, %v4230_v12 }
0x103c   :  { %v4234_v14 = vpop.permute.xlu0 %4233  ;;  %v4239_v15 = vpop.permute.xlu1 %4238 }
0x103d   :  { %v4236_v16 = vunpack.i.h.bf16 %v4234_v14  ;;  %v4235_v17 = vunpack.i.l.bf16 %v4234_v14  ;;  %v4241_v18 = vunpack.i.h.bf16 %v4239_v15  ;;  %v4240_v19 = vunpack.i.l.bf16 %v4239_v15  ;;  %4077 = vmatprep.subr.bf16.mxu0 %v4076_v13 }
0x103e   :  { %4079 = vmatpush3.bf16.msra.mxu0 %v4076_v13 }
0x103f   :  { %v4313_v20 = vpop.eup %4312  ;;  %v4086_v22 = vpack.c.bf16 %v4236_v16, %v4235_v17  ;;  %v4100_v23 = vpack.c.bf16 %v4241_v18, %v4240_v19 }
0x1040   :  { %v2617_v24 = vpop.permute.xlu1 %2616  ;;  %v2078_v25 = vmul.f32 %v4313_v20, %v4305_v55 }
0x1041   :  { %3878 = vmatmul.mubr.msk.f32.vlgmr.msra.gmra.mrb[14].mxu0 %vm312_vm3, %v1875_v21  ;;  %4087 = vmatprep.subr.bf16.mxu0 %v4086_v22 }
0x1042   :  { %4102 = vmatprep.subr.msk.bf16.mxu1 %vm4572_vm2, %v4100_v23  ;;  %3927 = vmatprep.mubr.msk.f32.mxu1 %vm224_vm1, %v2617_v24 }
0x1043   :  { %v4315_v26 = vpop.eup %4314  ;;  %4089 = vmatpush3.bf16.msra.mxu0 %v4086_v22  ;;  %3891 = vmatprep.mubr.msk.f32.mxu0 %vm312_vm3, %v2078_v25 }
0x1044   :  { %v2079_v27 = vmul.f32 %v4315_v26, %v4307_v58  ;;  %4105 = vmatpush3.bf16.xpose.msk.msra.mxu1 %vm4572_vm2, %v4100_v23  ;;  %v2619_v35 = vpop.permute.xlu1 %2618  ;;  %3894 = vmatprep.subr.mxu0 %v3523_v39  ;;  %v4352_v58 = vld [vmem:[%s5063_s28] sm:$0xff]  ;;  %s5072_s28 = smov 40   ;;  %v3525_v23 = vld [vmem:[%s5064_s30 + $0x38] sm:$0xff] }
0x1046   :  { %3892 = vmatmul.mubr.msk.f32.vlgmr.msra.gmra.mrb[16].mxu0 %vm312_vm3, %v2079_v27 }
0x1047   :  { %3895 = vmatpush3.msra.mxu0 %v3523_v39 }
0x1048   :  { %3899 = vmatprep.subr.mxu0 %v3522_v42 }
0x104b   :  { %3928 = vmatmul.mubr.msk.f32.vlgmr.msra.gmra.mrb[18].mxu1 %vm224_vm1, %v2619_v35 }
0x106d   :  { %v2426_v33 = vpop.xlane.xlu0 %2425 }
0x106e   :  { %v2430_v28 = vsub.f32 %v2422_v1, %v2426_v33  ;;  %v3559_v33 = vld [vmem:[%s5018_s7 + $0x1] ss:$0 sm:$0xff] }
0x1070   :  { %v2432_v31 = vmul.f32 1.442695, %v2430_v28 }
0x1075   :  { %v2429_v29 = vpop.xlane.xlu1 %2428 }
0x1076   :  { %v2431_v30 = vsub.f32 %v2423_v5, %v2429_v29 }
0x1078   :  { %v2434_v32 = vmul.f32 1.442695, %v2431_v30 }
0x107a   :  { %4316 = vpow2.f32 %v2434_v32 }
0x107b   :  { %4318 = vpow2.f32 %v2432_v31 }
0x1084   :  { %v4317_v34 = vpop.eup %4316 }
0x1085   :  { %v2439_v36 = vsel %vm312_vm3, %v4317_v34, 0.0  ;;  %v4319_v37 = vpop.eup %4318 }
0x1086   :  { %2440 = vadd.xlane.f32.xlu0 %v2439_v36  ;;  %v2436_v48 = vsel %vm312_vm3, %v4319_v37, 0.0 }
0x108a   :  { %2437 = vadd.xlane.f32.xlu0 %v2436_v48 }
0x10a0   :  { %4243 = vrot.lane.b32.xlu0 %v4778_v3, %s5071_s26 }
0x1113   :  { %v2441_v43 = vpop.xlane.xlu0 %2440 }
0x1114   :  { %v3879_v44 = vpop.f32.mrb[14].mxu0 }
0x1115   :  { %v1954_v45 = vpop.f32.mrb[15].mxu0 }
0x1117   :  { %v2438_v40 = vpop.xlane.xlu0 %2437 }
0x1118   :  { %4320 = vrcp.f32 %v2438_v40 }
0x1119   :  { %4322 = vrcp.f32 %v2441_v43  ;;  %v3893_v46 = vpop.f32.mrb[16].mxu0 }
0x111a   :  { %v2158_v47 = vpop.f32.mrb[17].mxu0 }
0x111b   :  { %v4244_v49 = vpop.permute.xlu0 %4243  ;;  %3896 = vmatprep.mubr.msk.f32.mxu0 %vm224_vm1, %v2158_v47 }
0x111c   :  { %v4246_v38 = vunpack.i.h.bf16 %v4244_v49  ;;  %v4245_v50 = vunpack.i.l.bf16 %v4244_v49  ;;  %3897 = vmatmul.mubr.msk.f32.vlgmr.msra.gmra.mrb[18].mxu0 %vm224_vm1, %v3893_v46  ;;  %v3565_v49 = vld [vmem:[%s5021_s10 + $0x28] sm:$0xff] }
0x111d   :  { %3901 = vmatprep.mubr.msk.f32.mxu0 %vm224_vm1, %v1954_v45  ;;  %3900 = vmatpush3.msra.mxu0 %v3522_v42 }
0x111e   :  { %v4096_v51 = vpack.c.bf16 %v4246_v38, %v4245_v50  ;;  %v3929_v52 = vpop.f32.mrb[18].mxu1  ;;  %v3566_v50 = vld [vmem:[%s5021_s10 + $0x30] sm:$0xff] }
0x111f   :  { %v2698_v53 = vpop.f32.mrb[19].mxu1  ;;  %v2708_v54 = vmul.f32 0.35355338, %v3929_v52 }
0x1120   :  { %v2707_v55 = vmul.f32 0.35355338, %v2698_v53  ;;  %4097 = vmatprep.subr.bf16.mxu0 %v4096_v51 }
0x1121   :  { %v2710_v5 = vadd.f32 %v4353_v41, %v2708_v54  ;;  %v3563_v41 = vld [vmem:[%s5020_s9 + $0x1] ss:$0 sm:$0xff] }
0x1122   :  { %v4321_v56 = vpop.eup %4320  ;;  %v2709_v61 = vadd.f32 %v4352_v58, %v2707_v55 }
0x1123   :  { %v4323_v62 = vpop.eup %4322  ;;  %v2444_v1 = vmul.f32 %v4321_v56, %v4319_v37  ;;  %v2714_v7 = vsel %vm312_vm3, %v2710_v5, -inf }
0x1124   :  { %v2711_v4 = vsel %vm312_vm3, %v2709_v61, -inf  ;;  %3902 = vmatmul.mubr.msk.f32.vlgmr.msra.gmra.mrb[18].mxu0 %vm224_vm1, %v3879_v44  ;;  %v2445_v6 = vmul.f32 %v4323_v62, %v4317_v34 }
0x1125   :  { %2712 = vmax.xlane.f32.xlu1 %v2711_v4  ;;  %4099 = vmatpush3.bf16.msra.mxu0 %v4096_v51  ;;  %v3567_v51 = vld [vmem:[%s5021_s10 + $0x38] sm:$0xff] }
0x1126   :  { %3915 = vmatprep.mubr.msk.f32.mxu0 %vm312_vm3, %v2444_v1  ;;  %3918 = vmatprep.subr.mxu0 %v3524_v2  ;;  %v4114_v52 = vpack.c.bf16 %v3567_v51, %v3566_v50  ;;  %v3562_v1 = vld [vmem:[%s5019_s8 + $0x1] ss:$0 sm:$0xff] }
0x1127   :  { %v3211_v51 = vld [vmem:[%s5027_s16] sm:$0xff] }
0x1128   :  { %3916 = vmatmul.mubr.msk.f32.vlgmr.msra.gmra.mrb[20].mxu0 %vm312_vm3, %v2445_v6 }
0x1129   :  { %2715 = vmax.xlane.f32.xlu1 %v2714_v7  ;;  %3919 = vmatpush3.msra.mxu0 %v3524_v2 }
0x11b2   :  { %v2713_v8 = vpop.xlane.xlu1 %2712 }
0x11b3   :  { %v2717_v9 = vsub.f32 %v2709_v61, %v2713_v8 }
0x11b5   :  { %v2719_v11 = vmul.f32 1.442695, %v2717_v9 }
0x11b6   :  { %v2716_v0 = vpop.xlane.xlu1 %2715 }
0x11b7   :  { %v2718_v10 = vsub.f32 %v2710_v5, %v2716_v0  ;;  %v3572_v0 = vld [vmem:[%s5023_s12 + $0x40] sm:$0xff] }
0x11b9   :  { %v2721_v63 = vmul.f32 1.442695, %v2718_v10  ;;  %v3573_v10 = vld [vmem:[%s5023_s12 + $0x48] sm:$0xff] }
0x11bb   :  { %4324 = vpow2.f32 %v2721_v63  ;;  %v3574_v63 = vld [vmem:[%s5023_s12 + $0x50] sm:$0xff] }
0x11bc   :  { %4326 = vpow2.f32 %v2719_v11  ;;  %v4118_v11 = vpack.c.bf16 %v3573_v10, %v3572_v0 }
0x11c5   :  { %v4325_v12 = vpop.eup %4324 }
0x11c6   :  { %v2726_v13 = vsel %vm312_vm3, %v4325_v12, 0.0  ;;  %v4327_v60 = vpop.eup %4326 }
0x11c7   :  { %2727 = vadd.xlane.f32.xlu1 %v2726_v13  ;;  %v2723_v14 = vsel %vm312_vm3, %v4327_v60, 0.0 }
0x11cb   :  { %2724 = vadd.xlane.f32.xlu1 %v2723_v14  ;;  %v3577_v14 = vld [vmem:[%s5023_s12 + $0x68] sm:$0xff] }
0x11dc   :  { %4248 = vrot.lane.b32.xlu1 %v4778_v3, %s5072_s28 }
0x11fb   :  { %v3917_v15 = vpop.f32.mrb[20].mxu0 }
0x11fc   :  { %v2524_v16 = vpop.f32.mrb[21].mxu0 }
0x11fd   :  { %3920 = vmatprep.mubr.msk.f32.mxu0 %vm224_vm1, %v2524_v16  ;;  %v3578_v16 = vld [vmem:[%s5023_s12 + $0x70] sm:$0xff] }
0x11fe   :  { %3921 = vmatmul.mubr.msk.f32.vlgmr.msra.gmra.mrb[18].mxu0 %vm224_vm1, %v3917_v15 }
0x1254   :  { %v2728_v17 = vpop.xlane.xlu1 %2727 }
0x1255   :  { %4328 = vrcp.f32 %v2728_v17  ;;  %v3579_v17 = vld [vmem:[%s5023_s12 + $0x78] sm:$0xff] }
0x1258   :  { %v2725_v18 = vpop.xlane.xlu1 %2724 }
0x1259   :  { %4330 = vrcp.f32 %v2725_v18  ;;  %v4130_v18 = vpack.c.bf16 %v3579_v17, %v3578_v16 }
0x125c   :  { %v4249_v19 = vpop.permute.xlu1 %4248 }
0x125d   :  { %v4251_v20 = vunpack.i.h.bf16 %v4249_v19  ;;  %v4250_v21 = vunpack.i.l.bf16 %v4249_v19  ;;  %v3569_v19 = vld [vmem:[%s5022_s11 + $0x1] ss:$0 sm:$0xff]  ;;  %s4354_s11 = scalar_lea.vmem %s3456_s6, 256 }
0x125e   :  { %p4355_p0 = scmp.ne.s32.totalorder %s3456_s6, %s4354_s11  ;;  %p4360_p2 = scmp.lt.s32.totalorder %s4354_s11, %s4354_s11 }
0x125f   :  { %v4106_v22 = vpack.c.bf16 %v4251_v20, %v4250_v21  ;;  %v4329_v3 = vpop.eup %4328 }
0x1260   :  { %v2732_v26 = vmul.f32 %v4329_v3, %v4325_v12  ;;  %v3575_v12 = vld [vmem:[%s5023_s12 + $0x58] sm:$0xff]  ;;  %p4361_p3 = por %p4360_p2, %p4359_p1 }
0x1261   :  { %4107 = vmatprep.subr.bf16.mxu0 %v4106_v22  ;;  %v4122_v13 = vpack.c.bf16 %v3575_v12, %v3574_v63  ;;  %v3313_v12 = vld [vmem:[%s5029_s18] sm:$0xff] }
0x1262   :  { %4109 = vmatpush3.bf16.msra.mxu0 %v4106_v22  ;;  %p4362_p4 = pnand %p4361_p3, %p4355_p0 }
0x1263   :  { %v4331_v24 = vpop.eup %4330  ;;  %3937 = vmatprep.subr.mxu0 %v3525_v23 }
0x1264   :  { %v2731_v25 = vmul.f32 %v4331_v24, %v4327_v60  ;;  %v3576_v60 = vld [vmem:[%s5023_s12 + $0x60] sm:$0xff] }
0x1265   :  { %v4126_v15 = vpack.c.bf16 %v3577_v14, %v3576_v60  ;;  %v3588_v14 = vld [vmem:[%s5028_s17] ss:$0 sm:$0xff] }
0x1266   :  { %3934 = vmatprep.mubr.msk.f32.mxu0 %vm312_vm3, %v2731_v25 }
0x1267   :  { %3935 = vmatmul.mubr.msk.f32.vlgmr.msra.gmra.mrb[22].mxu0 %vm312_vm3, %v2732_v26 }
0x1268   :  { %3938 = vmatpush3.msra.mxu0 %v3525_v23 }
0x1269   :  { %4119 = vmatprep.subr.bf16.mxu0 %v4118_v11 }
0x133a   :  { %v3936_v27 = vpop.f32.mrb[22].mxu0 }
0x133b   :  { %v2811_v35 = vpop.f32.mrb[23].mxu0 }
0x133c   :  { %3939 = vmatprep.mubr.msk.f32.mxu0 %vm224_vm1, %v2811_v35 }
0x133d   :  { %3940 = vmatmul.mubr.msk.f32.vlgmr.msra.gmra.mrb[18].mxu0 %vm224_vm1, %v3936_v27 }
0x133e   :  { %4121 = vmatpush3.bf16.msra.mxu0 %v4118_v11 }
0x133f   :  { %4123 = vmatprep.subr.bf16.mxu0 %v4122_v13 }
0x1342   :  { %4125 = vmatpush3.bf16.msra.mxu0 %v4122_v13  ;;  %v3314_v13 = vld [vmem:[%s5029_s18 + $0x8] sm:$0xff] }
0x1343   :  { %4127 = vmatprep.subr.bf16.mxu0 %v4126_v15  ;;  %v4142_v60 = vpack.c.bf16 %v3314_v13, %v3313_v12 }
0x1346   :  { %4129 = vmatpush3.bf16.msra.mxu0 %v4126_v15 }
0x1347   :  { %4131 = vmatprep.subr.bf16.mxu0 %v4130_v18 }
0x134a   :  { %4133 = vmatpush3.bf16.msra.mxu0 %v4130_v18 }
0x1410   :  { %v3941_v28 = vpop.f32.mrb[18].mxu0 }
0x1411   :  { %v2912_v29 = vadd.f32 %v3941_v28, %v3559_v33  ;;  %v2892_v30 = vpop.f32.mrb[19].mxu0 }
0x1412   :  { %v2911_v31 = vadd.f32 %v3559_v33, %v2892_v30 }
0x1413   :  { %v2914_v32 = vadd.f32 %v2912_v29, %v4763_v59 }
0x1414   :  { %v2913_v34 = vadd.f32 %v2911_v31, %v4759_v57  ;;  %v3564_v57 = vld [vmem:[%s5021_s10 + $0x20] sm:$0xff] }
0x1415   :  { %v2922_v36 = vsel %vm78_vm0, %v2914_v32, 0.0  ;;  %v4110_v38 = vpack.c.bf16 %v3565_v49, %v3564_v57  ;;  %v3581_v31 = vld [vmem:[%s5024_s13 + $0x1] ss:$0 sm:$0xff] }
0x1416   :  { %2923 = vadd.xlane.f32.xlu1 %v2922_v36  ;;  %v2919_v37 = vsel %vm78_vm0, %v2913_v34, 0.0 }
0x1417   :  { %2920 = vadd.xlane.f32.xlu0 %v2919_v37  ;;  %4111 = vmatprep.subr.bf16.mxu1 %v4110_v38 }
0x1418   :  { %4113 = vmatpush3.bf16.msra.mxu1 %v4110_v38 }
0x1419   :  { %4115 = vmatprep.subr.bf16.mxu1 %v4114_v52 }
0x141c   :  { %4117 = vmatpush3.bf16.msra.mxu1 %v4114_v52  ;;  %v3212_v52 = vld [vmem:[%s5027_s16 + $0x8] sm:$0xff] }
0x14a3   :  { %v2924_v48 = vpop.xlane.xlu1 %2923 }
0x14a4   :  { %v2926_v39 = vmul.f32 0.03125, %v2924_v48  ;;  %v2921_v42 = vpop.xlane.xlu0 %2920 }
0x14a5   :  { %v2925_v43 = vmul.f32 0.03125, %v2921_v42 }
0x14a6   :  { %v2928_v44 = vsub.f32 %v2914_v32, %v2926_v39 }
0x14a7   :  { %v2927_v45 = vsub.f32 %v2913_v34, %v2925_v43 }
0x14a8   :  { %v2930_v47 = vmul.f32 %v2928_v44, %v2928_v44 }
0x14a9   :  { %v2929_v40 = vmul.f32 %v2927_v45, %v2927_v45 }
0x14aa   :  { %v2934_v59 = vsel %vm78_vm0, %v2930_v47, 0.0 }
0x14ab   :  { %v2931_v46 = vsel %vm78_vm0, %v2929_v40, 0.0 }
0x14ac   :  { %2932 = vadd.xlane.f32.xlu0 %v2931_v46 }
0x14b0   :  { %2935 = vadd.xlane.f32.xlu0 %v2934_v59 }
0x1539   :  { %v2933_v53 = vpop.xlane.xlu0 %2932 }
0x153a   :  { %v2937_v54 = vmul.f32 0.03125, %v2933_v53  ;;  %v4134_v53 = vpack.c.bf16 %v3212_v52, %v3211_v51  ;;  %v3594_v51 = vld [vmem:[%s5031_s20] ss:$0 sm:$0xff] }
0x153c   :  { %v2939_v55 = vadd.f32 1e-05, %v2937_v54  ;;  %4135 = vmatprep.subr.bf16.mxu1 %v4134_v53  ;;  %v3213_v54 = vld [vmem:[%s5027_s16 + $0x10] sm:$0xff] }
0x153d   :  { %v2936_v56 = vpop.xlane.xlu0 %2935 }
0x153e   :  { %4332 = vrsqrt.f32 %v2939_v55  ;;  %v2938_v58 = vmul.f32 0.03125, %v2936_v56  ;;  %v3214_v55 = vld [vmem:[%s5027_s16 + $0x18] sm:$0xff] }
0x153f   :  { %v4138_v56 = vpack.c.bf16 %v3214_v55, %v3213_v54  ;;  %v3595_v55 = vld [vmem:[%s5032_s21] ss:$0 sm:$0xff] }
0x1540   :  { %v2940_v61 = vadd.f32 1e-05, %v2938_v58 }
0x1542   :  { %4334 = vrsqrt.f32 %v2940_v61 }
0x1548   :  { %v4333_v62 = vpop.eup %4332 }
0x1549   :  { %v2943_v4 = vmul.f32 %v4333_v62, %v2927_v45 }
0x154b   :  { %v2951_v5 = vmul.f32 %v3562_v1, %v2943_v4 }
0x154c   :  { %v4335_v6 = vpop.eup %4334 }
0x154d   :  { %v2944_v7 = vmul.f32 %v4335_v6, %v2928_v44  ;;  %v2959_v2 = vadd.f32 %v3563_v41, %v2951_v5  ;;  %v3586_v6 = vld [vmem:[%s5025_s14 + $0x1] ss:$0 sm:$0xff] }
0x154f   :  { %v2952_v8 = vmul.f32 %v3562_v1, %v2944_v7  ;;  %3950 = vmatprep.mubr.msk.f32.mxu1 %vm78_vm0, %v2959_v2 }
0x1551   :  { %v2960_v9 = vadd.f32 %v3563_v41, %v2952_v8 }
0x1553   :  { %3951 = vmatmul.mubr.msk.f32.vlgmr.msra.gmra.mrb[20].mxu1 %vm78_vm0, %v2960_v9 }
0x1554   :  { %4137 = vmatpush3.bf16.msra.mxu1 %v4134_v53 }
0x1555   :  { %4139 = vmatprep.subr.bf16.mxu1 %v4138_v56 }
0x1558   :  { %4141 = vmatpush3.bf16.msra.mxu1 %v4138_v56 }
0x1559   :  { %4143 = vmatprep.subr.bf16.mxu1 %v4142_v60 }
0x1626   :  { %v3952_v20 = vpop.f32.mrb[20].mxu1 }
0x1627   :  { %v3052_v21 = vadd.f32 %v3952_v20, %v3569_v19  ;;  %v3046_v22 = vpop.f32.mrb[21].mxu1 }
0x1628   :  { %v3047_v23 = vadd.f32 %v3569_v19, %v3046_v22 }
0x1629   :  { %v3058_v3 = vmul.f32 0.70710677, %v3052_v21  ;;  %v3056_v28 = vmul.f32 0.5, %v3052_v21 }
0x162a   :  { %v3057_v24 = vmul.f32 0.70710677, %v3047_v23  ;;  %v3055_v35 = vmul.f32 0.5, %v3047_v23 }
0x162b   :  { %4336 = verf.f32 %v3058_v3 }
0x162c   :  { %4338 = verf.f32 %v3057_v24 }
0x1635   :  { %v4337_v25 = vpop.eup %4336 }
0x1636   :  { %v4339_v26 = vpop.eup %4338  ;;  %v3062_v27 = vadd.f32 1.0, %v4337_v25 }
0x1637   :  { %v3061_v33 = vadd.f32 1.0, %v4339_v26 }
0x1638   :  { %v3064_v30 = vmul.f32 %v3062_v27, %v3056_v28 }
0x1639   :  { %v3063_v29 = vmul.f32 %v3061_v33, %v3055_v35  ;;  %v3591_v35 = vld [vmem:[%s5030_s19] ss:$0 sm:$0xff] }
0x163b   :  { %3969 = vmatprep.mubr.msk.f32.mxu0 %vm1534_vm4, %v3063_v29 }
0x163c   :  { %3970 = vmatmul.mubr.msk.f32.vlgmr.msra.gmra.mrb[24].mxu0 %vm1534_vm4, %v3064_v30 }
0x170f   :  { %v3971_v32 = vpop.f32.mrb[24].mxu0 }
0x1710   :  { %v3154_v34 = vpop.f32.mrb[25].mxu0  ;;  %v3160_v36 = vadd.f32 %v3971_v32, %v3581_v31 }
0x1711   :  { %v3155_v37 = vadd.f32 %v3581_v31, %v3154_v34 }
0x1712   :  { %v3164_v42 = vadd.f32 %v3160_v36, %v2960_v9 }
0x1713   :  { %v3163_v48 = vadd.f32 %v3155_v37, %v2959_v2  ;;  %v3587_v2 = vld [vmem:[%s5026_s15 + $0x1] ss:$0 sm:$0xff] }
0x1714   :  { %v3172_v43 = vsel %vm78_vm0, %v3164_v42, 0.0 }
0x1715   :  { %v3169_v39 = vsel %vm78_vm0, %v3163_v48, 0.0 }
0x1716   :  { %3170 = vadd.xlane.f32.xlu0 %v3169_v39 }
0x171a   :  { %3173 = vadd.xlane.f32.xlu0 %v3172_v43 }
0x17a3   :  { %v3171_v44 = vpop.xlane.xlu0 %3170 }
0x17a4   :  { %v3175_v45 = vmul.f32 0.03125, %v3171_v44 }
0x17a6   :  { %v3177_v40 = vsub.f32 %v3163_v48, %v3175_v45 }
0x17a7   :  { %v3174_v46 = vpop.xlane.xlu0 %3173 }
0x17a8   :  { %v3176_v47 = vmul.f32 0.03125, %v3174_v46  ;;  %v3179_v59 = vmul.f32 %v3177_v40, %v3177_v40 }
0x17aa   :  { %v3178_v57 = vsub.f32 %v3164_v42, %v3176_v47  ;;  %v3181_v49 = vsel %vm78_vm0, %v3179_v59, 0.0 }
0x17ab   :  { %3182 = vadd.xlane.f32.xlu0 %v3181_v49 }
0x17ac   :  { %v3180_v38 = vmul.f32 %v3178_v57, %v3178_v57 }
0x17ae   :  { %v3184_v50 = vsel %vm78_vm0, %v3180_v38, 0.0 }
0x17af   :  { %3185 = vadd.xlane.f32.xlu1 %v3184_v50 }
0x1838   :  { %v3183_v58 = vpop.xlane.xlu0 %3182 }
0x1839   :  { %v3187_v61 = vmul.f32 0.03125, %v3183_v58 }
0x183b   :  { %v3189_v62 = vadd.f32 1e-05, %v3187_v61 }
0x183c   :  { %v3186_v1 = vpop.xlane.xlu1 %3185 }
0x183d   :  { %4340 = vrsqrt.f32 %v3189_v62  ;;  %v3188_v4 = vmul.f32 0.03125, %v3186_v1 }
0x183f   :  { %v3190_v41 = vadd.f32 1e-05, %v3188_v4 }
0x1841   :  { %4342 = vrsqrt.f32 %v3190_v41 }
0x1847   :  { %v4341_v5 = vpop.eup %4340 }
0x1848   :  { %v3193_v7 = vmul.f32 %v4341_v5, %v3177_v40 }
0x184a   :  { %v3201_v8 = vmul.f32 %v3586_v6, %v3193_v7 }
0x184b   :  { %v4343_v9 = vpop.eup %4342 }
0x184c   :  { %v3194_v0 = vmul.f32 %v4343_v9, %v3178_v57  ;;  %v3209_v10 = vadd.f32 %v3587_v2, %v3201_v8 }
0x184e   :  { %v3202_v11 = vmul.f32 %v3586_v6, %v3194_v0  ;;  %3980 = vmatprep.mubr.msk.f32.mxu1 %vm78_vm0, %v3209_v10 }
0x1850   :  { %v3210_v63 = vadd.f32 %v3587_v2, %v3202_v11 }
0x1852   :  { %3981 = vmatmul.mubr.msk.f32.vlgmr.msra.gmra.mrb[22].mxu1 %vm78_vm0, %v3210_v63 }
0x1853   :  { %4145 = vmatpush3.bf16.msra.mxu1 %v4142_v60 }
0x1925   :  { %v3982_v15 = vpop.f32.mrb[22].mxu1 }
0x1926   :  { %v3300_v16 = vadd.f32 %v3982_v15, %v3588_v14  ;;  %v3294_v17 = vpop.f32.mrb[23].mxu1 }
0x1927   :  { %v3295_v18 = vadd.f32 %v3588_v14, %v3294_v17 }
0x1928   :  { %v3306_v19 = vmul.f32 0.70710677, %v3300_v16  ;;  %v3304_v25 = vmul.f32 0.5, %v3300_v16 }
0x1929   :  { %v3305_v20 = vmul.f32 0.70710677, %v3295_v18  ;;  %v3303_v3 = vmul.f32 0.5, %v3295_v18 }
0x192a   :  { %4344 = verf.f32 %v3306_v19 }
0x192b   :  { %4346 = verf.f32 %v3305_v20 }
0x1934   :  { %v4345_v21 = vpop.eup %4344 }
0x1935   :  { %v4347_v22 = vpop.eup %4346  ;;  %v3310_v23 = vadd.f32 1.0, %v4345_v21 }
0x1936   :  { %v3309_v24 = vadd.f32 1.0, %v4347_v22 }
0x1937   :  { %v3312_v27 = vmul.f32 %v3310_v23, %v3304_v25 }
0x1938   :  { %v3311_v26 = vmul.f32 %v3309_v24, %v3303_v3 }
0x193a   :  { %3987 = vmatprep.mubr.msk.f32.mxu1 %vm312_vm3, %v3311_v26 }
0x193b   :  { %3988 = vmatmul.mubr.msk.f32.vlgmr.msra.gmra.mrb[24].mxu1 %vm312_vm3, %v3312_v27 }
0x1a0e   :  { %v3989_v33 = vpop.f32.mrb[24].mxu1 }
0x1a0f   :  { %v3400_v28 = vadd.f32 %v3989_v33, %v3591_v35  ;;  %v3394_v29 = vpop.f32.mrb[25].mxu1 }
0x1a10   :  { %v3395_v30 = vadd.f32 %v3591_v35, %v3394_v29 }
0x1a11   :  { %v3408_v31 = vsel %vm312_vm3, %v3400_v28, 0.0 }
0x1a12   :  { %3409 = vadd.xlane.f32.xlu1 %v3408_v31  ;;  %v3405_v32 = vsel %vm312_vm3, %v3395_v30, 0.0 }
0x1a13   :  { %3406 = vadd.xlane.f32.xlu0 %v3405_v32 }
0x1a9f   :  { %v3410_v34 = vpop.xlane.xlu1 %3409 }
0x1aa0   :  { %v3413_v36 = vmul.f32 0.0625, %v3410_v34  ;;  %v3407_v37 = vpop.xlane.xlu0 %3406 }
0x1aa1   :  { %v3412_v48 = vmul.f32 0.0625, %v3407_v37 }
0x1aa2   :  { %v3415_v39 = vsub.f32 %v3400_v28, %v3413_v36 }
0x1aa3   :  { %v3414_v42 = vsub.f32 %v3395_v30, %v3412_v48 }
0x1aa4   :  { %v3417_v43 = vmul.f32 %v3415_v39, %v3415_v39 }
0x1aa5   :  { %v3416_v44 = vmul.f32 %v3414_v42, %v3414_v42 }
0x1aa6   :  { %v3421_v45 = vsel %vm312_vm3, %v3417_v43, 0.0 }
0x1aa7   :  { %3422 = vadd.xlane.f32.xlu1 %v3421_v45  ;;  %v3418_v40 = vsel %vm312_vm3, %v3416_v44, 0.0 }
0x1aa8   :  { %3419 = vadd.xlane.f32.xlu0 %v3418_v40 }
0x1b34   :  { %v3423_v46 = vpop.xlane.xlu1 %3422 }
0x1b35   :  { %v3425_v47 = vmul.f32 0.0625, %v3423_v46  ;;  %v3420_v59 = vpop.xlane.xlu0 %3419 }
0x1b36   :  { %v3424_v57 = vmul.f32 0.0625, %v3420_v59 }
0x1b37   :  { %v3427_v49 = vadd.f32 1e-05, %v3425_v47 }
0x1b38   :  { %v3426_v38 = vadd.f32 1e-05, %v3424_v57 }
0x1b39   :  { %4348 = vrsqrt.f32 %v3427_v49 }
0x1b3a   :  { %4350 = vrsqrt.f32 %v3426_v38 }
0x1b43   :  { %v4349_v50 = vpop.eup %4348 }
0x1b44   :  { %v4351_v52 = vpop.eup %4350  ;;  %v3431_v53 = vmul.f32 %v4349_v50, %v3415_v39 }
0x1b45   :  { %v3430_v54 = vmul.f32 %v4351_v52, %v3414_v42 }
0x1b46   :  { %v3439_v56 = vmul.f32 %v3594_v51, %v3431_v53 }
0x1b47   :  { %v3438_v58 = vmul.f32 %v3594_v51, %v3430_v54 }
0x1b48   :  { %v3447_v61 = vadd.f32 %v3595_v55, %v3439_v56 }
0x1b49   :  { %v3446_v62 = vadd.f32 %v3595_v55, %v3438_v58 }
0x1b4a   :  { %3449 = vst.msk [vmem:[#allocation2 + $0x8] sm:$0xff] %vm312_vm3, %v3447_v61 }
0x1b4b   :  { %3448 = vst.msk [vmem:[#allocation2] sm:$0xff] %vm312_vm3, %v3446_v62 }
0x1b4c   :  { %4365 = shalt.err (!%p4362_p4)
}
0x1b4d   :  { %s4366_s12 = scalar_lea.hbm %s5033_s22, 256 }
0x1b4e   :  { %p4367_p5 = scmp.ne.s32.totalorder %s5033_s22, %s4366_s12  ;;  %p4370_p6 = scmp.lt.u32.totalorder %s4366_s12, %s5033_s22 }
0x1b50   :  { %p4372_p7 = pnand %p4370_p6, %p4367_p5 }
0x1b52   :  { %4375 = shalt.err (!%p4372_p7)
}
0x1b53   :  { %s4390_s8 = smov 128   ;;  %s4391_s27 = smov 8  }
0x1b54   :  { %3461 = dma.vmem_to_hbm [thread:$0]  %s3456_s6, 256, %s5033_s22, [#allocation3], %s4390_s8, %s4390_s8, %s4391_s27  }
0x1b55   :  { %4376 = dma.done.wait [#allocation3], 256  }
0x1b56   :  { %4377 = vsyncadd [#allocation3], 4294967040 }
0x1b57   :  { %3465 = vsyncpa [#allocation3], 1 }

</bundles_post_ra>
